<compile_context>
chip_gen: v6e
topology: v6e:2x2x1
jax: 0.10.0
libtpu: 0.0.40
codegen_flags: <defaults>
</compile_context>

<pallas_src>
import jax
import jax.numpy as jnp
from jax import lax
from jax.experimental import pallas as pl
from jax.experimental.pallas import tpu as pltpu

X_PAD = 12   # x_head outputs X_PAD - 1 = 11 classes
Y_PAD = 10   # y_head outputs Y_PAD - 1 = 9  classes
O_PAD = 8    # o_head outputs O_PAD - 1 = 7  classes


# --------------------------------------------------------------------------
# Pallas kernel 1: fused bidirectional GRU.
#   grid=(2,) parallel over direction; the entire time recurrence runs inside
#   the kernel with fused gate matmuls; weights + activations stay in VMEM.
# --------------------------------------------------------------------------
def _bigru_kernel(x_ref, w_ih_ref, w_hh_ref, b_ih_ref, b_hh_ref, out_ref):
    # x_ref     : (T, B, H)        time-major input (shared by both directions)
    # w_ih_ref  : (1, H, 3H)       this direction's fused input->gates weight
    # w_hh_ref  : (1, H, 3H)       this direction's fused hidden->gates weight
    # b_ih_ref  : (1, 1, 3H)
    # b_hh_ref  : (1, 1, 3H)
    # out_ref   : (1, T, B, H)     this direction's slab of the (2,T,B,H) output
    d = pl.program_id(0)                 # 0 = forward, 1 = backward
    T, B, H = x_ref.shape

    w_ih = w_ih_ref[0]                   # (H, 3H)
    w_hh = w_hh_ref[0]                   # (H, 3H)
    b_ih = b_ih_ref[0]                   # (1, 3H)
    b_hh = b_hh_ref[0]                   # (1, 3H)

    def step(s, h):
        # forward walks t = s; backward walks t = T-1-s (and writes to t).
        t = d * (T - 1) + (1 - 2 * d) * s
        x_t = x_ref[t]                                                     # (B, H)
        gi = jnp.dot(x_t, w_ih, preferred_element_type=jnp.float32) + b_ih  # (B, 3H)
        gh = jnp.dot(h, w_hh, preferred_element_type=jnp.float32) + b_hh    # (B, 3H)
        r = jax.nn.sigmoid(gi[:, 0:H] + gh[:, 0:H])
        z = jax.nn.sigmoid(gi[:, H:2 * H] + gh[:, H:2 * H])
        n = jnp.tanh(gi[:, 2 * H:3 * H] + r * gh[:, 2 * H:3 * H])
        h_new = (1.0 - z) * n + z * h
        out_ref[0, t] = h_new
        return h_new

    h0 = jnp.zeros((B, H), jnp.float32)
    lax.fori_loop(0, T, step, h0, unroll=True)


def bigru(x_tbh, p):
    """Bidirectional GRU. Input time-major (T,B,H); returns batch-first (B,T,2H)."""
    T, B, H = x_tbh.shape
    out = pl.pallas_call(
        _bigru_kernel,
        out_shape=jax.ShapeDtypeStruct((2, T, B, H), jnp.float32),
        grid_spec=pltpu.PrefetchScalarGridSpec(
            num_scalar_prefetch=0,
            grid=(2,),
            in_specs=[
                pl.BlockSpec((T, B, H), lambda d: (0, 0, 0)),
                pl.BlockSpec((1, H, 3 * H), lambda d: (d, 0, 0)),
                pl.BlockSpec((1, H, 3 * H), lambda d: (d, 0, 0)),
                pl.BlockSpec((1, 1, 3 * H), lambda d: (d, 0, 0)),
                pl.BlockSpec((1, 1, 3 * H), lambda d: (d, 0, 0)),
            ],
            out_specs=pl.BlockSpec((1, T, B, H), lambda d: (d, 0, 0, 0)),
        ),
        compiler_params=pltpu.CompilerParams(dimension_semantics=("parallel",)),
    )(x_tbh, p["w_ih"], p["w_hh"], p["b_ih"], p["b_hh"])
    # (2, T, B, H) -> (B, T, 2H): fwd in lanes [0:H], bwd in lanes [H:2H].
    return jnp.transpose(out, (2, 1, 0, 3)).reshape(B, T, 2 * H)


# --------------------------------------------------------------------------
# Pallas kernel 2: fused text-attention + packed x/y/o heads + log_softmax.
#   Single grid step; full batch in VMEM; one packed (B, Tc, nx+ny+no) output.
# --------------------------------------------------------------------------
def _attn_heads_kernel(text_ref, clip_ref,
                       wv_ref, bv_ref, wh_ref, bh_ref, wu_ref,
                       whc_ref, whz_ref, bhd_ref,
                       out_ref):
    nx, ny = X_PAD - 1, Y_PAD - 1
    B = text_ref.shape[0]

    wv = wv_ref[...]
    bv = bv_ref[...]
    wh = wh_ref[...]
    bh = bh_ref[...]
    wu = wu_ref[...]                      # (1, H)
    whc = whc_ref[...]                    # (2H, P)  clip-part of fused heads
    whz = whz_ref[...]                    # (2H, P)  attn-part of fused heads
    bhd = bhd_ref[...]                    # (1, P)

    def log_softmax(v):
        m = jnp.max(v, axis=-1, keepdims=True)
        s = v - m
        return s - jnp.log(jnp.sum(jnp.exp(s), axis=-1, keepdims=True))

    # Static unroll over the (small) batch; every element's work is 2-D MXU
    # matmuls on VMEM-resident tiles, interleaved freely by the scheduler.
    for b in range(B):
        text = text_ref[b]                # (Tt, 2H)
        clip = clip_ref[b]                # (Tc, 2H)

        o_v = jnp.dot(text, wv, preferred_element_type=jnp.float32) + bv   # (Tt, H)
        o_h = jnp.dot(clip, wh, preferred_element_type=jnp.float32) + bh   # (Tc, H)

        f = jnp.tanh(o_v[None, :, :] + o_h[:, None, :])                    # (Tc, Tt, H)
        # TODO(synk): at production sizes (H>=512, long Tt) tile over Tt with an
        # online-softmax accumulation instead of materializing (Tc, Tt, H).
        scores = jnp.sum(f * wu, axis=-1)                                   # (Tc, Tt)

        m = jnp.max(scores, axis=-1, keepdims=True)
        e = jnp.exp(scores - m)
        a = e / jnp.sum(e, axis=-1, keepdims=True)                          # softmax over text

        z = jnp.dot(a, text, preferred_element_type=jnp.float32)            # (Tc, 2H)

        # Fused heads: one column-packed logits matmul pair -> (Tc, nx+ny+no).
        logits = (jnp.dot(clip, whc, preferred_element_type=jnp.float32)
                  + jnp.dot(z, whz, preferred_element_type=jnp.float32)
                  + bhd)

        out_ref[b] = jnp.concatenate(
            [log_softmax(logits[:, 0:nx]),
             log_softmax(logits[:, nx:nx + ny]),
             log_softmax(logits[:, nx + ny:])], axis=-1)


def decoder_heads(text_enc, clip_enc, p):
    B, Tt, H2 = text_enc.shape
    _, Tc, _ = clip_enc.shape
    H = H2 // 2
    nx, ny, no = X_PAD - 1, Y_PAD - 1, O_PAD - 1
    P = nx + ny + no

    # Column-wise fusion of the three heads (done once, outside the kernel).
    whc = jnp.concatenate([p["wxc"], p["wyc"], p["woc"]], axis=1)   # (2H, P)
    whz = jnp.concatenate([p["wxz"], p["wyz"], p["woz"]], axis=1)   # (2H, P)
    bhd = jnp.concatenate([p["bx"], p["by"], p["bo"]], axis=1)      # (1, P)

    def full(shape):
        n = len(shape)
        return pl.BlockSpec(shape, lambda i, _n=n: (0,) * _n)

    packed = pl.pallas_call(
        _attn_heads_kernel,
        out_shape=jax.ShapeDtypeStruct((B, Tc, P), jnp.float32),
        grid_spec=pltpu.PrefetchScalarGridSpec(
            num_scalar_prefetch=0,
            grid=(1,),
            in_specs=[
                full((B, Tt, H2)), full((B, Tc, H2)),
                full((H2, H)), full((1, H)),
                full((H2, H)), full((1, H)),
                full((1, H)),
                full((H2, P)), full((H2, P)), full((1, P)),
            ],
            out_specs=full((B, Tc, P)),
        ),
        compiler_params=pltpu.CompilerParams(dimension_semantics=("arbitrary",)),
    )(text_enc, clip_enc, p["wv"], p["bv"], p["wh"], p["bh"], p["wu"], whc, whz, bhd)

    return packed[..., :nx], packed[..., nx:nx + ny], packed[..., nx + ny:]


# --------------------------------------------------------------------------
# Full model forward (embedding gathers are plain-JAX glue).
# TODO(synk): the embedding gather could be fused into the GRU kernel via
# scalar-prefetched indices at production sizes; kept as glue here.
# --------------------------------------------------------------------------
def model_forward(params, text_inds, clip_inds):
    # Gather with transposed indices -> time-major (T, B, H) with no transpose op.
    text_emb = params["text_embed"][text_inds.T]     # (Tt, B, H)
    clip_emb = params["clip_embed"][clip_inds.T]     # (Tc, B, H)
    text_enc = bigru(text_emb, params["text_rnn"])   # (B, Tt, 2H)
    clip_enc = bigru(clip_emb, params["clip_rnn"])   # (B, Tc, 2H)
    return decoder_heads(text_enc, clip_enc, params["heads"])


# --------------------------------------------------------------------------
# Pure-JAX reference (same math) for correctness checking.
# --------------------------------------------------------------------------
def _gru_ref(x_tbh, w_ih, w_hh, b_ih, b_hh):
    H = x_tbh.shape[-1]

    def cell(h, x_t):
        gi = x_t @ w_ih + b_ih
        gh = h @ w_hh + b_hh
        r = jax.nn.sigmoid(gi[:, 0:H] + gh[:, 0:H])
        z = jax.nn.sigmoid(gi[:, H:2 * H] + gh[:, H:2 * H])
        n = jnp.tanh(gi[:, 2 * H:] + r * gh[:, 2 * H:])
        h_new = (1.0 - z) * n + z * h
        return h_new, h_new

    h0 = jnp.zeros((x_tbh.shape[1], H), jnp.float32)
    _, ys = lax.scan(cell, h0, x_tbh)
    return ys


def _bigru_ref(x_bth, p):
    x_tbh = jnp.transpose(x_bth, (1, 0, 2))
    fwd = _gru_ref(x_tbh, p["w_ih"][0], p["w_hh"][0], p["b_ih"][0], p["b_hh"][0])
    bwd = _gru_ref(x_tbh[::-1], p["w_ih"][1], p["w_hh"][1], p["b_ih"][1], p["b_hh"][1])[::-1]
    return jnp.transpose(jnp.concatenate([fwd, bwd], axis=-1), (1, 0, 2))


def _decoder_ref(text_enc, clip_enc, p):
    o_v = text_enc @ p["wv"] + p["bv"]                              # (B, Tt, H)
    o_h = clip_enc @ p["wh"] + p["bh"]                              # (B, Tc, H)
    f = jnp.tanh(o_v[:, None, :, :] + o_h[:, :, None, :])           # (B, Tc, Tt, H)
    scores = jnp.sum(f * p["wu"][0], axis=-1)                        # (B, Tc, Tt)
    a = jax.nn.softmax(scores, axis=-1)
    z = jnp.einsum("bct,bth->bch", a, text_enc)                      # (B, Tc, 2H)

    def head(wc, wz, b):
        return jax.nn.log_softmax(clip_enc @ wc + z @ wz + b, axis=-1)

    return (head(p["wxc"], p["wxz"], p["bx"]),
            head(p["wyc"], p["wyz"], p["by"]),
            head(p["woc"], p["woz"], p["bo"]))


def model_forward_ref(params, text_inds, clip_inds):
    text_enc = _bigru_ref(params["text_embed"][text_inds], params["text_rnn"])
    clip_enc = _bigru_ref(params["clip_embed"][clip_inds], params["clip_rnn"])
    return _decoder_ref(text_enc, clip_enc, params["heads"])


# --------------------------------------------------------------------------
# Deterministic parameter init (shapes from the module's __init__; GRU gate
# weights stored pre-fused as (2 directions, H, 3H) with column order [r|z|n]).
# --------------------------------------------------------------------------
def init_params(key, H, vocab_size, num_cliparts):
    nx, ny, no = X_PAD - 1, Y_PAD - 1, O_PAD - 1
    keys = iter(jax.random.split(key, 64))

    def nrm(shape, scale=0.1):
        return scale * jax.random.normal(next(keys), shape, dtype=jnp.float32)

    def gru_params():
        return {"w_ih": nrm((2, H, 3 * H)), "w_hh": nrm((2, H, 3 * H)),
                "b_ih": nrm((2, 1, 3 * H)), "b_hh": nrm((2, 1, 3 * H))}

    text_embed = nrm((vocab_size, H)).at[0].set(0.0)     # padding_idx=0
    clip_embed = nrm((num_cliparts, H)).at[0].set(0.0)   # padding_idx=0

    heads = {
        "wv": nrm((2 * H, H)), "bv": nrm((1, H)),
        "wh": nrm((2 * H, H)), "bh": nrm((1, H)),
        "wu": nrm((1, H)),
        "wxc": nrm((2 * H, nx)), "wxz": nrm((2 * H, nx)), "bx": nrm((1, nx)),
        "wyc": nrm((2 * H, ny)), "wyz": nrm((2 * H, ny)), "by": nrm((1, ny)),
        "woc": nrm((2 * H, no)), "woz": nrm((2 * H, no)), "bo": nrm((1, no)),
    }
    return {"text_embed": text_embed, "clip_embed": clip_embed,
            "text_rnn": gru_params(), "clip_rnn": gru_params(), "heads": heads}


if __name__ == "__main__":
    B, Tt, Tc, H = 2, 8, 6, 32
    vocab_size, num_cliparts = 50, 20

    root = jax.random.PRNGKey(0)
    k_param, k_text, k_clip = jax.random.split(root, 3)
    params = init_params(k_param, H, vocab_size, num_cliparts)

    text_inds = jax.random.randint(k_text, (B, Tt), 0, vocab_size, dtype=jnp.int32)
    clip_inds = jax.random.randint(k_clip, (B, Tc), 0, num_cliparts, dtype=jnp.int32)

    outs = jax.block_until_ready(model_forward(params, text_inds, clip_inds))
    refs = jax.block_until_ready(model_forward_ref(params, text_inds, clip_inds))

    expected_shapes = [(B, Tc, X_PAD - 1), (B, Tc, Y_PAD - 1), (B, Tc, O_PAD - 1)]
    for o, r, es in zip(outs, refs, expected_shapes):
        assert o.shape == es, (o.shape, es)
        assert jnp.all(jnp.isfinite(o))
        assert jnp.allclose(o, r, atol=5e-2, rtol=5e-2), float(jnp.max(jnp.abs(o - r)))

    print("KERNEL_OK")
</pallas_src>

<mosaic_0001>
module attributes {stable_mosaic.version = 11 : i64} {
  func.func @_bigru_kernel(%arg0: i32, %arg1: memref<8x2x32xf32, #tpu.memory_space<vmem>>, %arg2: memref<1x32x96xf32, #tpu.memory_space<vmem>>, %arg3: memref<1x32x96xf32, #tpu.memory_space<vmem>>, %arg4: memref<1x1x96xf32, #tpu.memory_space<vmem>>, %arg5: memref<1x1x96xf32, #tpu.memory_space<vmem>>, %arg6: memref<1x8x2x32xf32, #tpu.memory_space<vmem>>) attributes {dimension_semantics = [#tpu.dimension_semantics<parallel>], iteration_bounds = array<i64: 2>, scalar_prefetch = 0 : i64, scratch_operands = 0 : i64, tpu.core_type = #tpu.core_type<tc>, window_params = [{pipeline_mode = #tpu.pipeline_mode<synchronous>, transform_indices = @transform_0, window_bounds = array<i64: 8, 2, 32>}, {transform_indices = @transform_1, window_bounds = array<i64: 1, 32, 96>}, {transform_indices = @transform_2, window_bounds = array<i64: 1, 32, 96>}, {transform_indices = @transform_3, window_bounds = array<i64: 1, 1, 96>}, {transform_indices = @transform_4, window_bounds = array<i64: 1, 1, 96>}, {transform_indices = @transform_5, window_bounds = array<i64: 1, 8, 2, 32>}]} {
    %c0 = arith.constant 0 : index
    %c0_0 = arith.constant 0 : index
    %c0_1 = arith.constant 0 : index
    %0 = vector.load %arg2[%c0, %c0_0, %c0_1] : memref<1x32x96xf32, #tpu.memory_space<vmem>>, vector<1x32x96xf32>
    %1 = vector.shape_cast %0 : vector<1x32x96xf32> to vector<32x96xf32>
    %c0_2 = arith.constant 0 : index
    %c0_3 = arith.constant 0 : index
    %c0_4 = arith.constant 0 : index
    %2 = vector.load %arg3[%c0_2, %c0_3, %c0_4] : memref<1x32x96xf32, #tpu.memory_space<vmem>>, vector<1x32x96xf32>
    %3 = vector.shape_cast %2 : vector<1x32x96xf32> to vector<32x96xf32>
    %c0_5 = arith.constant 0 : index
    %c0_6 = arith.constant 0 : index
    %c0_7 = arith.constant 0 : index
    %4 = vector.load %arg4[%c0_5, %c0_6, %c0_7] : memref<1x1x96xf32, #tpu.memory_space<vmem>>, vector<1x1x96xf32>
    %5 = vector.shape_cast %4 : vector<1x1x96xf32> to vector<1x96xf32>
    %c0_8 = arith.constant 0 : index
    %c0_9 = arith.constant 0 : index
    %c0_10 = arith.constant 0 : index
    %6 = vector.load %arg5[%c0_8, %c0_9, %c0_10] : memref<1x1x96xf32, #tpu.memory_space<vmem>>, vector<1x1x96xf32>
    %7 = vector.shape_cast %6 : vector<1x1x96xf32> to vector<1x96xf32>
    %cst = arith.constant 0.000000e+00 : f32
    %8 = vector.broadcast %cst : f32 to vector<2x32xf32>
    %c0_i32 = arith.constant 0 : i32
    %c7_i32 = arith.constant 7 : i32
    %9 = arith.muli %arg0, %c7_i32 : i32
    %c2_i32 = arith.constant 2 : i32
    %10 = arith.muli %c2_i32, %arg0 : i32
    %c1_i32 = arith.constant 1 : i32
    %11 = arith.subi %c1_i32, %10 : i32
    %12 = arith.muli %11, %c0_i32 : i32
    %13 = arith.addi %9, %12 : i32
    %14 = arith.index_cast %13 : i32 to index
    %c0_11 = arith.constant 0 : index
    %c0_12 = arith.constant 0 : index
    %15 = vector.load %arg1[%14, %c0_11, %c0_12] : memref<8x2x32xf32, #tpu.memory_space<vmem>>, vector<1x2x32xf32>
    %16 = vector.shape_cast %15 : vector<1x2x32xf32> to vector<2x32xf32>
    %cst_13 = arith.constant dense<0.000000e+00> : vector<2x96xf32>
    %17 = tpu.matmul %16, %1, %cst_13 {dimension_numbers = #tpu.dot_dimension_numbers<[1], [0], [0], [1], [0, 0, 1, 1], [], []>} : vector<2x32xf32>, vector<32x96xf32>, vector<2x96xf32> -> vector<2x96xf32>
    %18 = vector.broadcast %5 : vector<1x96xf32> to vector<2x96xf32>
    %19 = arith.addf %17, %18 : vector<2x96xf32>
    %cst_14 = arith.constant dense<0.000000e+00> : vector<2x96xf32>
    %20 = tpu.matmul %8, %3, %cst_14 {dimension_numbers = #tpu.dot_dimension_numbers<[1], [0], [0], [1], [0, 0, 1, 1], [], []>} : vector<2x32xf32>, vector<32x96xf32>, vector<2x96xf32> -> vector<2x96xf32>
    %21 = vector.broadcast %7 : vector<1x96xf32> to vector<2x96xf32>
    %22 = arith.addf %20, %21 : vector<2x96xf32>
    %23 = vector.extract_strided_slice %19 {offsets = [0, 0], sizes = [2, 32], strides = [1, 1]} : vector<2x96xf32> to vector<2x32xf32>
    %24 = vector.extract_strided_slice %22 {offsets = [0, 0], sizes = [2, 32], strides = [1, 1]} : vector<2x96xf32> to vector<2x32xf32>
    %25 = arith.addf %23, %24 : vector<2x32xf32>
    %26 = arith.negf %25 : vector<2x32xf32>
    %27 = math.exp %26 : vector<2x32xf32>
    %cst_15 = arith.constant 1.000000e+00 : f32
    %28 = vector.broadcast %cst_15 : f32 to vector<2x32xf32>
    %29 = arith.addf %28, %27 : vector<2x32xf32>
    %30 = arith.divf %28, %29 : vector<2x32xf32>
    %31 = vector.extract_strided_slice %19 {offsets = [0, 32], sizes = [2, 32], strides = [1, 1]} : vector<2x96xf32> to vector<2x32xf32>
    %32 = vector.extract_strided_slice %22 {offsets = [0, 32], sizes = [2, 32], strides = [1, 1]} : vector<2x96xf32> to vector<2x32xf32>
    %33 = arith.addf %31, %32 : vector<2x32xf32>
    %34 = arith.negf %33 : vector<2x32xf32>
    %35 = math.exp %34 : vector<2x32xf32>
    %cst_16 = arith.constant 1.000000e+00 : f32
    %36 = vector.broadcast %cst_16 : f32 to vector<2x32xf32>
    %37 = arith.addf %36, %35 : vector<2x32xf32>
    %38 = arith.divf %36, %37 : vector<2x32xf32>
    %39 = vector.extract_strided_slice %19 {offsets = [0, 64], sizes = [2, 32], strides = [1, 1]} : vector<2x96xf32> to vector<2x32xf32>
    %40 = vector.extract_strided_slice %22 {offsets = [0, 64], sizes = [2, 32], strides = [1, 1]} : vector<2x96xf32> to vector<2x32xf32>
    %41 = arith.mulf %30, %40 : vector<2x32xf32>
    %42 = arith.addf %39, %41 : vector<2x32xf32>
    %43 = math.tanh %42 : vector<2x32xf32>
    %cst_17 = arith.constant 1.000000e+00 : f32
    %44 = vector.broadcast %cst_17 : f32 to vector<2x32xf32>
    %45 = arith.subf %44, %38 : vector<2x32xf32>
    %46 = arith.mulf %45, %43 : vector<2x32xf32>
    %47 = arith.mulf %38, %8 : vector<2x32xf32>
    %48 = arith.addf %46, %47 : vector<2x32xf32>
    %c0_18 = arith.constant 0 : index
    %49 = arith.index_cast %13 : i32 to index
    %c0_19 = arith.constant 0 : index
    %c0_20 = arith.constant 0 : index
    %50 = vector.load %arg6[%c0_18, %49, %c0_19, %c0_20] : memref<1x8x2x32xf32, #tpu.memory_space<vmem>>, vector<1x1x2x32xf32>
    %51 = vector.shape_cast %50 : vector<1x1x2x32xf32> to vector<2x32xf32>
    %52 = vector.shape_cast %48 : vector<2x32xf32> to vector<1x1x2x32xf32>
    tpu.vector_store %arg6[%c0_18, %49, %c0_19, %c0_20], %52 {strides = array<i32>} : memref<1x8x2x32xf32, #tpu.memory_space<vmem>>, vector<1x1x2x32xf32>,
    %c1_i32_21 = arith.constant 1 : i32
    %c7_i32_22 = arith.constant 7 : i32
    %53 = arith.muli %arg0, %c7_i32_22 : i32
    %c2_i32_23 = arith.constant 2 : i32
    %54 = arith.muli %c2_i32_23, %arg0 : i32
    %c1_i32_24 = arith.constant 1 : i32
    %55 = arith.subi %c1_i32_24, %54 : i32
    %56 = arith.muli %55, %c1_i32_21 : i32
    %57 = arith.addi %53, %56 : i32
    %58 = arith.index_cast %57 : i32 to index
    %c0_25 = arith.constant 0 : index
    %c0_26 = arith.constant 0 : index
    %59 = vector.load %arg1[%58, %c0_25, %c0_26] : memref<8x2x32xf32, #tpu.memory_space<vmem>>, vector<1x2x32xf32>
    %60 = vector.shape_cast %59 : vector<1x2x32xf32> to vector<2x32xf32>
    %cst_27 = arith.constant dense<0.000000e+00> : vector<2x96xf32>
    %61 = tpu.matmul %60, %1, %cst_27 {dimension_numbers = #tpu.dot_dimension_numbers<[1], [0], [0], [1], [0, 0, 1, 1], [], []>} : vector<2x32xf32>, vector<32x96xf32>, vector<2x96xf32> -> vector<2x96xf32>
    %62 = vector.broadcast %5 : vector<1x96xf32> to vector<2x96xf32>
    %63 = arith.addf %61, %62 : vector<2x96xf32>
    %cst_28 = arith.constant dense<0.000000e+00> : vector<2x96xf32>
    %64 = tpu.matmul %48, %3, %cst_28 {dimension_numbers = #tpu.dot_dimension_numbers<[1], [0], [0], [1], [0, 0, 1, 1], [], []>} : vector<2x32xf32>, vector<32x96xf32>, vector<2x96xf32> -> vector<2x96xf32>
    %65 = vector.broadcast %7 : vector<1x96xf32> to vector<2x96xf32>
    %66 = arith.addf %64, %65 : vector<2x96xf32>
    %67 = vector.extract_strided_slice %63 {offsets = [0, 0], sizes = [2, 32], strides = [1, 1]} : vector<2x96xf32> to vector<2x32xf32>
    %68 = vector.extract_strided_slice %66 {offsets = [0, 0], sizes = [2, 32], strides = [1, 1]} : vector<2x96xf32> to vector<2x32xf32>
    %69 = arith.addf %67, %68 : vector<2x32xf32>
    %70 = arith.negf %69 : vector<2x32xf32>
    %71 = math.exp %70 : vector<2x32xf32>
    %cst_29 = arith.constant 1.000000e+00 : f32
    %72 = vector.broadcast %cst_29 : f32 to vector<2x32xf32>
    %73 = arith.addf %72, %71 : vector<2x32xf32>
    %74 = arith.divf %72, %73 : vector<2x32xf32>
    %75 = vector.extract_strided_slice %63 {offsets = [0, 32], sizes = [2, 32], strides = [1, 1]} : vector<2x96xf32> to vector<2x32xf32>
    %76 = vector.extract_strided_slice %66 {offsets = [0, 32], sizes = [2, 32], strides = [1, 1]} : vector<2x96xf32> to vector<2x32xf32>
    %77 = arith.addf %75, %76 : vector<2x32xf32>
    %78 = arith.negf %77 : vector<2x32xf32>
    %79 = math.exp %78 : vector<2x32xf32>
    %cst_30 = arith.constant 1.000000e+00 : f32
    %80 = vector.broadcast %cst_30 : f32 to vector<2x32xf32>
    %81 = arith.addf %80, %79 : vector<2x32xf32>
    %82 = arith.divf %80, %81 : vector<2x32xf32>
    %83 = vector.extract_strided_slice %63 {offsets = [0, 64], sizes = [2, 32], strides = [1, 1]} : vector<2x96xf32> to vector<2x32xf32>
    %84 = vector.extract_strided_slice %66 {offsets = [0, 64], sizes = [2, 32], strides = [1, 1]} : vector<2x96xf32> to vector<2x32xf32>
    %85 = arith.mulf %74, %84 : vector<2x32xf32>
    %86 = arith.addf %83, %85 : vector<2x32xf32>
    %87 = math.tanh %86 : vector<2x32xf32>
    %cst_31 = arith.constant 1.000000e+00 : f32
    %88 = vector.broadcast %cst_31 : f32 to vector<2x32xf32>
    %89 = arith.subf %88, %82 : vector<2x32xf32>
    %90 = arith.mulf %89, %87 : vector<2x32xf32>
    %91 = arith.mulf %82, %48 : vector<2x32xf32>
    %92 = arith.addf %90, %91 : vector<2x32xf32>
    %c0_32 = arith.constant 0 : index
    %93 = arith.index_cast %57 : i32 to index
    %c0_33 = arith.constant 0 : index
    %c0_34 = arith.constant 0 : index
    %94 = vector.load %arg6[%c0_32, %93, %c0_33, %c0_34] : memref<1x8x2x32xf32, #tpu.memory_space<vmem>>, vector<1x1x2x32xf32>
    %95 = vector.shape_cast %94 : vector<1x1x2x32xf32> to vector<2x32xf32>
    %96 = vector.shape_cast %92 : vector<2x32xf32> to vector<1x1x2x32xf32>
    tpu.vector_store %arg6[%c0_32, %93, %c0_33, %c0_34], %96 {strides = array<i32>} : memref<1x8x2x32xf32, #tpu.memory_space<vmem>>, vector<1x1x2x32xf32>,
    %c2_i32_35 = arith.constant 2 : i32
    %c7_i32_36 = arith.constant 7 : i32
    %97 = arith.muli %arg0, %c7_i32_36 : i32
    %c2_i32_37 = arith.constant 2 : i32
    %98 = arith.muli %c2_i32_37, %arg0 : i32
    %c1_i32_38 = arith.constant 1 : i32
    %99 = arith.subi %c1_i32_38, %98 : i32
    %100 = arith.muli %99, %c2_i32_35 : i32
    %101 = arith.addi %97, %100 : i32
    %102 = arith.index_cast %101 : i32 to index
    %c0_39 = arith.constant 0 : index
    %c0_40 = arith.constant 0 : index
    %103 = vector.load %arg1[%102, %c0_39, %c0_40] : memref<8x2x32xf32, #tpu.memory_space<vmem>>, vector<1x2x32xf32>
    %104 = vector.shape_cast %103 : vector<1x2x32xf32> to vector<2x32xf32>
    %cst_41 = arith.constant dense<0.000000e+00> : vector<2x96xf32>
    %105 = tpu.matmul %104, %1, %cst_41 {dimension_numbers = #tpu.dot_dimension_numbers<[1], [0], [0], [1], [0, 0, 1, 1], [], []>} : vector<2x32xf32>, vector<32x96xf32>, vector<2x96xf32> -> vector<2x96xf32>
    %106 = vector.broadcast %5 : vector<1x96xf32> to vector<2x96xf32>
    %107 = arith.addf %105, %106 : vector<2x96xf32>
    %cst_42 = arith.constant dense<0.000000e+00> : vector<2x96xf32>
    %108 = tpu.matmul %92, %3, %cst_42 {dimension_numbers = #tpu.dot_dimension_numbers<[1], [0], [0], [1], [0, 0, 1, 1], [], []>} : vector<2x32xf32>, vector<32x96xf32>, vector<2x96xf32> -> vector<2x96xf32>
    %109 = vector.broadcast %7 : vector<1x96xf32> to vector<2x96xf32>
    %110 = arith.addf %108, %109 : vector<2x96xf32>
    %111 = vector.extract_strided_slice %107 {offsets = [0, 0], sizes = [2, 32], strides = [1, 1]} : vector<2x96xf32> to vector<2x32xf32>
    %112 = vector.extract_strided_slice %110 {offsets = [0, 0], sizes = [2, 32], strides = [1, 1]} : vector<2x96xf32> to vector<2x32xf32>
    %113 = arith.addf %111, %112 : vector<2x32xf32>
    %114 = arith.negf %113 : vector<2x32xf32>
    %115 = math.exp %114 : vector<2x32xf32>
    %cst_43 = arith.constant 1.000000e+00 : f32
    %116 = vector.broadcast %cst_43 : f32 to vector<2x32xf32>
    %117 = arith.addf %116, %115 : vector<2x32xf32>
    %118 = arith.divf %116, %117 : vector<2x32xf32>
    %119 = vector.extract_strided_slice %107 {offsets = [0, 32], sizes = [2, 32], strides = [1, 1]} : vector<2x96xf32> to vector<2x32xf32>
    %120 = vector.extract_strided_slice %110 {offsets = [0, 32], sizes = [2, 32], strides = [1, 1]} : vector<2x96xf32> to vector<2x32xf32>
    %121 = arith.addf %119, %120 : vector<2x32xf32>
    %122 = arith.negf %121 : vector<2x32xf32>
    %123 = math.exp %122 : vector<2x32xf32>
    %cst_44 = arith.constant 1.000000e+00 : f32
    %124 = vector.broadcast %cst_44 : f32 to vector<2x32xf32>
    %125 = arith.addf %124, %123 : vector<2x32xf32>
    %126 = arith.divf %124, %125 : vector<2x32xf32>
    %127 = vector.extract_strided_slice %107 {offsets = [0, 64], sizes = [2, 32], strides = [1, 1]} : vector<2x96xf32> to vector<2x32xf32>
    %128 = vector.extract_strided_slice %110 {offsets = [0, 64], sizes = [2, 32], strides = [1, 1]} : vector<2x96xf32> to vector<2x32xf32>
    %129 = arith.mulf %118, %128 : vector<2x32xf32>
    %130 = arith.addf %127, %129 : vector<2x32xf32>
    %131 = math.tanh %130 : vector<2x32xf32>
    %cst_45 = arith.constant 1.000000e+00 : f32
    %132 = vector.broadcast %cst_45 : f32 to vector<2x32xf32>
    %133 = arith.subf %132, %126 : vector<2x32xf32>
    %134 = arith.mulf %133, %131 : vector<2x32xf32>
    %135 = arith.mulf %126, %92 : vector<2x32xf32>
    %136 = arith.addf %134, %135 : vector<2x32xf32>
    %c0_46 = arith.constant 0 : index
    %137 = arith.index_cast %101 : i32 to index
    %c0_47 = arith.constant 0 : index
    %c0_48 = arith.constant 0 : index
    %138 = vector.load %arg6[%c0_46, %137, %c0_47, %c0_48] : memref<1x8x2x32xf32, #tpu.memory_space<vmem>>, vector<1x1x2x32xf32>
    %139 = vector.shape_cast %138 : vector<1x1x2x32xf32> to vector<2x32xf32>
    %140 = vector.shape_cast %136 : vector<2x32xf32> to vector<1x1x2x32xf32>
    tpu.vector_store %arg6[%c0_46, %137, %c0_47, %c0_48], %140 {strides = array<i32>} : memref<1x8x2x32xf32, #tpu.memory_space<vmem>>, vector<1x1x2x32xf32>,
    %c3_i32 = arith.constant 3 : i32
    %c7_i32_49 = arith.constant 7 : i32
    %141 = arith.muli %arg0, %c7_i32_49 : i32
    %c2_i32_50 = arith.constant 2 : i32
    %142 = arith.muli %c2_i32_50, %arg0 : i32
    %c1_i32_51 = arith.constant 1 : i32
    %143 = arith.subi %c1_i32_51, %142 : i32
    %144 = arith.muli %143, %c3_i32 : i32
    %145 = arith.addi %141, %144 : i32
    %146 = arith.index_cast %145 : i32 to index
    %c0_52 = arith.constant 0 : index
    %c0_53 = arith.constant 0 : index
    %147 = vector.load %arg1[%146, %c0_52, %c0_53] : memref<8x2x32xf32, #tpu.memory_space<vmem>>, vector<1x2x32xf32>
    %148 = vector.shape_cast %147 : vector<1x2x32xf32> to vector<2x32xf32>
    %cst_54 = arith.constant dense<0.000000e+00> : vector<2x96xf32>
    %149 = tpu.matmul %148, %1, %cst_54 {dimension_numbers = #tpu.dot_dimension_numbers<[1], [0], [0], [1], [0, 0, 1, 1], [], []>} : vector<2x32xf32>, vector<32x96xf32>, vector<2x96xf32> -> vector<2x96xf32>
    %150 = vector.broadcast %5 : vector<1x96xf32> to vector<2x96xf32>
    %151 = arith.addf %149, %150 : vector<2x96xf32>
    %cst_55 = arith.constant dense<0.000000e+00> : vector<2x96xf32>
    %152 = tpu.matmul %136, %3, %cst_55 {dimension_numbers = #tpu.dot_dimension_numbers<[1], [0], [0], [1], [0, 0, 1, 1], [], []>} : vector<2x32xf32>, vector<32x96xf32>, vector<2x96xf32> -> vector<2x96xf32>
    %153 = vector.broadcast %7 : vector<1x96xf32> to vector<2x96xf32>
    %154 = arith.addf %152, %153 : vector<2x96xf32>
    %155 = vector.extract_strided_slice %151 {offsets = [0, 0], sizes = [2, 32], strides = [1, 1]} : vector<2x96xf32> to vector<2x32xf32>
    %156 = vector.extract_strided_slice %154 {offsets = [0, 0], sizes = [2, 32], strides = [1, 1]} : vector<2x96xf32> to vector<2x32xf32>
    %157 = arith.addf %155, %156 : vector<2x32xf32>
    %158 = arith.negf %157 : vector<2x32xf32>
    %159 = math.exp %158 : vector<2x32xf32>
    %cst_56 = arith.constant 1.000000e+00 : f32
    %160 = vector.broadcast %cst_56 : f32 to vector<2x32xf32>
    %161 = arith.addf %160, %159 : vector<2x32xf32>
    %162 = arith.divf %160, %161 : vector<2x32xf32>
    %163 = vector.extract_strided_slice %151 {offsets = [0, 32], sizes = [2, 32], strides = [1, 1]} : vector<2x96xf32> to vector<2x32xf32>
    %164 = vector.extract_strided_slice %154 {offsets = [0, 32], sizes = [2, 32], strides = [1, 1]} : vector<2x96xf32> to vector<2x32xf32>
    %165 = arith.addf %163, %164 : vector<2x32xf32>
    %166 = arith.negf %165 : vector<2x32xf32>
    %167 = math.exp %166 : vector<2x32xf32>
    %cst_57 = arith.constant 1.000000e+00 : f32
    %168 = vector.broadcast %cst_57 : f32 to vector<2x32xf32>
    %169 = arith.addf %168, %167 : vector<2x32xf32>
    %170 = arith.divf %168, %169 : vector<2x32xf32>
    %171 = vector.extract_strided_slice %151 {offsets = [0, 64], sizes = [2, 32], strides = [1, 1]} : vector<2x96xf32> to vector<2x32xf32>
    %172 = vector.extract_strided_slice %154 {offsets = [0, 64], sizes = [2, 32], strides = [1, 1]} : vector<2x96xf32> to vector<2x32xf32>
    %173 = arith.mulf %162, %172 : vector<2x32xf32>
    %174 = arith.addf %171, %173 : vector<2x32xf32>
    %175 = math.tanh %174 : vector<2x32xf32>
    %cst_58 = arith.constant 1.000000e+00 : f32
    %176 = vector.broadcast %cst_58 : f32 to vector<2x32xf32>
    %177 = arith.subf %176, %170 : vector<2x32xf32>
    %178 = arith.mulf %177, %175 : vector<2x32xf32>
    %179 = arith.mulf %170, %136 : vector<2x32xf32>
    %180 = arith.addf %178, %179 : vector<2x32xf32>
    %c0_59 = arith.constant 0 : index
    %181 = arith.index_cast %145 : i32 to index
    %c0_60 = arith.constant 0 : index
    %c0_61 = arith.constant 0 : index
    %182 = vector.load %arg6[%c0_59, %181, %c0_60, %c0_61] : memref<1x8x2x32xf32, #tpu.memory_space<vmem>>, vector<1x1x2x32xf32>
    %183 = vector.shape_cast %182 : vector<1x1x2x32xf32> to vector<2x32xf32>
    %184 = vector.shape_cast %180 : vector<2x32xf32> to vector<1x1x2x32xf32>
    tpu.vector_store %arg6[%c0_59, %181, %c0_60, %c0_61], %184 {strides = array<i32>} : memref<1x8x2x32xf32, #tpu.memory_space<vmem>>, vector<1x1x2x32xf32>,
    %c4_i32 = arith.constant 4 : i32
    %c7_i32_62 = arith.constant 7 : i32
    %185 = arith.muli %arg0, %c7_i32_62 : i32
    %c2_i32_63 = arith.constant 2 : i32
    %186 = arith.muli %c2_i32_63, %arg0 : i32
    %c1_i32_64 = arith.constant 1 : i32
    %187 = arith.subi %c1_i32_64, %186 : i32
    %188 = arith.muli %187, %c4_i32 : i32
    %189 = arith.addi %185, %188 : i32
    %190 = arith.index_cast %189 : i32 to index
    %c0_65 = arith.constant 0 : index
    %c0_66 = arith.constant 0 : index
    %191 = vector.load %arg1[%190, %c0_65, %c0_66] : memref<8x2x32xf32, #tpu.memory_space<vmem>>, vector<1x2x32xf32>
    %192 = vector.shape_cast %191 : vector<1x2x32xf32> to vector<2x32xf32>
    %cst_67 = arith.constant dense<0.000000e+00> : vector<2x96xf32>
    %193 = tpu.matmul %192, %1, %cst_67 {dimension_numbers = #tpu.dot_dimension_numbers<[1], [0], [0], [1], [0, 0, 1, 1], [], []>} : vector<2x32xf32>, vector<32x96xf32>, vector<2x96xf32> -> vector<2x96xf32>
    %194 = vector.broadcast %5 : vector<1x96xf32> to vector<2x96xf32>
    %195 = arith.addf %193, %194 : vector<2x96xf32>
    %cst_68 = arith.constant dense<0.000000e+00> : vector<2x96xf32>
    %196 = tpu.matmul %180, %3, %cst_68 {dimension_numbers = #tpu.dot_dimension_numbers<[1], [0], [0], [1], [0, 0, 1, 1], [], []>} : vector<2x32xf32>, vector<32x96xf32>, vector<2x96xf32> -> vector<2x96xf32>
    %197 = vector.broadcast %7 : vector<1x96xf32> to vector<2x96xf32>
    %198 = arith.addf %196, %197 : vector<2x96xf32>
    %199 = vector.extract_strided_slice %195 {offsets = [0, 0], sizes = [2, 32], strides = [1, 1]} : vector<2x96xf32> to vector<2x32xf32>
    %200 = vector.extract_strided_slice %198 {offsets = [0, 0], sizes = [2, 32], strides = [1, 1]} : vector<2x96xf32> to vector<2x32xf32>
    %201 = arith.addf %199, %200 : vector<2x32xf32>
    %202 = arith.negf %201 : vector<2x32xf32>
    %203 = math.exp %202 : vector<2x32xf32>
    %cst_69 = arith.constant 1.000000e+00 : f32
    %204 = vector.broadcast %cst_69 : f32 to vector<2x32xf32>
    %205 = arith.addf %204, %203 : vector<2x32xf32>
    %206 = arith.divf %204, %205 : vector<2x32xf32>
    %207 = vector.extract_strided_slice %195 {offsets = [0, 32], sizes = [2, 32], strides = [1, 1]} : vector<2x96xf32> to vector<2x32xf32>
    %208 = vector.extract_strided_slice %198 {offsets = [0, 32], sizes = [2, 32], strides = [1, 1]} : vector<2x96xf32> to vector<2x32xf32>
    %209 = arith.addf %207, %208 : vector<2x32xf32>
    %210 = arith.negf %209 : vector<2x32xf32>
    %211 = math.exp %210 : vector<2x32xf32>
    %cst_70 = arith.constant 1.000000e+00 : f32
    %212 = vector.broadcast %cst_70 : f32 to vector<2x32xf32>
    %213 = arith.addf %212, %211 : vector<2x32xf32>
    %214 = arith.divf %212, %213 : vector<2x32xf32>
    %215 = vector.extract_strided_slice %195 {offsets = [0, 64], sizes = [2, 32], strides = [1, 1]} : vector<2x96xf32> to vector<2x32xf32>
    %216 = vector.extract_strided_slice %198 {offsets = [0, 64], sizes = [2, 32], strides = [1, 1]} : vector<2x96xf32> to vector<2x32xf32>
    %217 = arith.mulf %206, %216 : vector<2x32xf32>
    %218 = arith.addf %215, %217 : vector<2x32xf32>
    %219 = math.tanh %218 : vector<2x32xf32>
    %cst_71 = arith.constant 1.000000e+00 : f32
    %220 = vector.broadcast %cst_71 : f32 to vector<2x32xf32>
    %221 = arith.subf %220, %214 : vector<2x32xf32>
    %222 = arith.mulf %221, %219 : vector<2x32xf32>
    %223 = arith.mulf %214, %180 : vector<2x32xf32>
    %224 = arith.addf %222, %223 : vector<2x32xf32>
    %c0_72 = arith.constant 0 : index
    %225 = arith.index_cast %189 : i32 to index
    %c0_73 = arith.constant 0 : index
    %c0_74 = arith.constant 0 : index
    %226 = vector.load %arg6[%c0_72, %225, %c0_73, %c0_74] : memref<1x8x2x32xf32, #tpu.memory_space<vmem>>, vector<1x1x2x32xf32>
    %227 = vector.shape_cast %226 : vector<1x1x2x32xf32> to vector<2x32xf32>
    %228 = vector.shape_cast %224 : vector<2x32xf32> to vector<1x1x2x32xf32>
    tpu.vector_store %arg6[%c0_72, %225, %c0_73, %c0_74], %228 {strides = array<i32>} : memref<1x8x2x32xf32, #tpu.memory_space<vmem>>, vector<1x1x2x32xf32>,
    %c5_i32 = arith.constant 5 : i32
    %c7_i32_75 = arith.constant 7 : i32
    %229 = arith.muli %arg0, %c7_i32_75 : i32
    %c2_i32_76 = arith.constant 2 : i32
    %230 = arith.muli %c2_i32_76, %arg0 : i32
    %c1_i32_77 = arith.constant 1 : i32
    %231 = arith.subi %c1_i32_77, %230 : i32
    %232 = arith.muli %231, %c5_i32 : i32
    %233 = arith.addi %229, %232 : i32
    %234 = arith.index_cast %233 : i32 to index
    %c0_78 = arith.constant 0 : index
    %c0_79 = arith.constant 0 : index
    %235 = vector.load %arg1[%234, %c0_78, %c0_79] : memref<8x2x32xf32, #tpu.memory_space<vmem>>, vector<1x2x32xf32>
    %236 = vector.shape_cast %235 : vector<1x2x32xf32> to vector<2x32xf32>
    %cst_80 = arith.constant dense<0.000000e+00> : vector<2x96xf32>
    %237 = tpu.matmul %236, %1, %cst_80 {dimension_numbers = #tpu.dot_dimension_numbers<[1], [0], [0], [1], [0, 0, 1, 1], [], []>} : vector<2x32xf32>, vector<32x96xf32>, vector<2x96xf32> -> vector<2x96xf32>
    %238 = vector.broadcast %5 : vector<1x96xf32> to vector<2x96xf32>
    %239 = arith.addf %237, %238 : vector<2x96xf32>
    %cst_81 = arith.constant dense<0.000000e+00> : vector<2x96xf32>
    %240 = tpu.matmul %224, %3, %cst_81 {dimension_numbers = #tpu.dot_dimension_numbers<[1], [0], [0], [1], [0, 0, 1, 1], [], []>} : vector<2x32xf32>, vector<32x96xf32>, vector<2x96xf32> -> vector<2x96xf32>
    %241 = vector.broadcast %7 : vector<1x96xf32> to vector<2x96xf32>
    %242 = arith.addf %240, %241 : vector<2x96xf32>
    %243 = vector.extract_strided_slice %239 {offsets = [0, 0], sizes = [2, 32], strides = [1, 1]} : vector<2x96xf32> to vector<2x32xf32>
    %244 = vector.extract_strided_slice %242 {offsets = [0, 0], sizes = [2, 32], strides = [1, 1]} : vector<2x96xf32> to vector<2x32xf32>
    %245 = arith.addf %243, %244 : vector<2x32xf32>
    %246 = arith.negf %245 : vector<2x32xf32>
    %247 = math.exp %246 : vector<2x32xf32>
    %cst_82 = arith.constant 1.000000e+00 : f32
    %248 = vector.broadcast %cst_82 : f32 to vector<2x32xf32>
    %249 = arith.addf %248, %247 : vector<2x32xf32>
    %250 = arith.divf %248, %249 : vector<2x32xf32>
    %251 = vector.extract_strided_slice %239 {offsets = [0, 32], sizes = [2, 32], strides = [1, 1]} : vector<2x96xf32> to vector<2x32xf32>
    %252 = vector.extract_strided_slice %242 {offsets = [0, 32], sizes = [2, 32], strides = [1, 1]} : vector<2x96xf32> to vector<2x32xf32>
    %253 = arith.addf %251, %252 : vector<2x32xf32>
    %254 = arith.negf %253 : vector<2x32xf32>
    %255 = math.exp %254 : vector<2x32xf32>
    %cst_83 = arith.constant 1.000000e+00 : f32
    %256 = vector.broadcast %cst_83 : f32 to vector<2x32xf32>
    %257 = arith.addf %256, %255 : vector<2x32xf32>
    %258 = arith.divf %256, %257 : vector<2x32xf32>
    %259 = vector.extract_strided_slice %239 {offsets = [0, 64], sizes = [2, 32], strides = [1, 1]} : vector<2x96xf32> to vector<2x32xf32>
    %260 = vector.extract_strided_slice %242 {offsets = [0, 64], sizes = [2, 32], strides = [1, 1]} : vector<2x96xf32> to vector<2x32xf32>
    %261 = arith.mulf %250, %260 : vector<2x32xf32>
    %262 = arith.addf %259, %261 : vector<2x32xf32>
    %263 = math.tanh %262 : vector<2x32xf32>
    %cst_84 = arith.constant 1.000000e+00 : f32
    %264 = vector.broadcast %cst_84 : f32 to vector<2x32xf32>
    %265 = arith.subf %264, %258 : vector<2x32xf32>
    %266 = arith.mulf %265, %263 : vector<2x32xf32>
    %267 = arith.mulf %258, %224 : vector<2x32xf32>
    %268 = arith.addf %266, %267 : vector<2x32xf32>
    %c0_85 = arith.constant 0 : index
    %269 = arith.index_cast %233 : i32 to index
    %c0_86 = arith.constant 0 : index
    %c0_87 = arith.constant 0 : index
    %270 = vector.load %arg6[%c0_85, %269, %c0_86, %c0_87] : memref<1x8x2x32xf32, #tpu.memory_space<vmem>>, vector<1x1x2x32xf32>
    %271 = vector.shape_cast %270 : vector<1x1x2x32xf32> to vector<2x32xf32>
    %272 = vector.shape_cast %268 : vector<2x32xf32> to vector<1x1x2x32xf32>
    tpu.vector_store %arg6[%c0_85, %269, %c0_86, %c0_87], %272 {strides = array<i32>} : memref<1x8x2x32xf32, #tpu.memory_space<vmem>>, vector<1x1x2x32xf32>,
    %c6_i32 = arith.constant 6 : i32
    %c7_i32_88 = arith.constant 7 : i32
    %273 = arith.muli %arg0, %c7_i32_88 : i32
    %c2_i32_89 = arith.constant 2 : i32
    %274 = arith.muli %c2_i32_89, %arg0 : i32
    %c1_i32_90 = arith.constant 1 : i32
    %275 = arith.subi %c1_i32_90, %274 : i32
    %276 = arith.muli %275, %c6_i32 : i32
    %277 = arith.addi %273, %276 : i32
    %278 = arith.index_cast %277 : i32 to index
    %c0_91 = arith.constant 0 : index
    %c0_92 = arith.constant 0 : index
    %279 = vector.load %arg1[%278, %c0_91, %c0_92] : memref<8x2x32xf32, #tpu.memory_space<vmem>>, vector<1x2x32xf32>
    %280 = vector.shape_cast %279 : vector<1x2x32xf32> to vector<2x32xf32>
    %cst_93 = arith.constant dense<0.000000e+00> : vector<2x96xf32>
    %281 = tpu.matmul %280, %1, %cst_93 {dimension_numbers = #tpu.dot_dimension_numbers<[1], [0], [0], [1], [0, 0, 1, 1], [], []>} : vector<2x32xf32>, vector<32x96xf32>, vector<2x96xf32> -> vector<2x96xf32>
    %282 = vector.broadcast %5 : vector<1x96xf32> to vector<2x96xf32>
    %283 = arith.addf %281, %282 : vector<2x96xf32>
    %cst_94 = arith.constant dense<0.000000e+00> : vector<2x96xf32>
    %284 = tpu.matmul %268, %3, %cst_94 {dimension_numbers = #tpu.dot_dimension_numbers<[1], [0], [0], [1], [0, 0, 1, 1], [], []>} : vector<2x32xf32>, vector<32x96xf32>, vector<2x96xf32> -> vector<2x96xf32>
    %285 = vector.broadcast %7 : vector<1x96xf32> to vector<2x96xf32>
    %286 = arith.addf %284, %285 : vector<2x96xf32>
    %287 = vector.extract_strided_slice %283 {offsets = [0, 0], sizes = [2, 32], strides = [1, 1]} : vector<2x96xf32> to vector<2x32xf32>
    %288 = vector.extract_strided_slice %286 {offsets = [0, 0], sizes = [2, 32], strides = [1, 1]} : vector<2x96xf32> to vector<2x32xf32>
    %289 = arith.addf %287, %288 : vector<2x32xf32>
    %290 = arith.negf %289 : vector<2x32xf32>
    %291 = math.exp %290 : vector<2x32xf32>
    %cst_95 = arith.constant 1.000000e+00 : f32
    %292 = vector.broadcast %cst_95 : f32 to vector<2x32xf32>
    %293 = arith.addf %292, %291 : vector<2x32xf32>
    %294 = arith.divf %292, %293 : vector<2x32xf32>
    %295 = vector.extract_strided_slice %283 {offsets = [0, 32], sizes = [2, 32], strides = [1, 1]} : vector<2x96xf32> to vector<2x32xf32>
    %296 = vector.extract_strided_slice %286 {offsets = [0, 32], sizes = [2, 32], strides = [1, 1]} : vector<2x96xf32> to vector<2x32xf32>
    %297 = arith.addf %295, %296 : vector<2x32xf32>
    %298 = arith.negf %297 : vector<2x32xf32>
    %299 = math.exp %298 : vector<2x32xf32>
    %cst_96 = arith.constant 1.000000e+00 : f32
    %300 = vector.broadcast %cst_96 : f32 to vector<2x32xf32>
    %301 = arith.addf %300, %299 : vector<2x32xf32>
    %302 = arith.divf %300, %301 : vector<2x32xf32>
    %303 = vector.extract_strided_slice %283 {offsets = [0, 64], sizes = [2, 32], strides = [1, 1]} : vector<2x96xf32> to vector<2x32xf32>
    %304 = vector.extract_strided_slice %286 {offsets = [0, 64], sizes = [2, 32], strides = [1, 1]} : vector<2x96xf32> to vector<2x32xf32>
    %305 = arith.mulf %294, %304 : vector<2x32xf32>
    %306 = arith.addf %303, %305 : vector<2x32xf32>
    %307 = math.tanh %306 : vector<2x32xf32>
    %cst_97 = arith.constant 1.000000e+00 : f32
    %308 = vector.broadcast %cst_97 : f32 to vector<2x32xf32>
    %309 = arith.subf %308, %302 : vector<2x32xf32>
    %310 = arith.mulf %309, %307 : vector<2x32xf32>
    %311 = arith.mulf %302, %268 : vector<2x32xf32>
    %312 = arith.addf %310, %311 : vector<2x32xf32>
    %c0_98 = arith.constant 0 : index
    %313 = arith.index_cast %277 : i32 to index
    %c0_99 = arith.constant 0 : index
    %c0_100 = arith.constant 0 : index
    %314 = vector.load %arg6[%c0_98, %313, %c0_99, %c0_100] : memref<1x8x2x32xf32, #tpu.memory_space<vmem>>, vector<1x1x2x32xf32>
    %315 = vector.shape_cast %314 : vector<1x1x2x32xf32> to vector<2x32xf32>
    %316 = vector.shape_cast %312 : vector<2x32xf32> to vector<1x1x2x32xf32>
    tpu.vector_store %arg6[%c0_98, %313, %c0_99, %c0_100], %316 {strides = array<i32>} : memref<1x8x2x32xf32, #tpu.memory_space<vmem>>, vector<1x1x2x32xf32>,
    %c7_i32_101 = arith.constant 7 : i32
    %c7_i32_102 = arith.constant 7 : i32
    %317 = arith.muli %arg0, %c7_i32_102 : i32
    %c2_i32_103 = arith.constant 2 : i32
    %318 = arith.muli %c2_i32_103, %arg0 : i32
    %c1_i32_104 = arith.constant 1 : i32
    %319 = arith.subi %c1_i32_104, %318 : i32
    %320 = arith.muli %319, %c7_i32_101 : i32
    %321 = arith.addi %317, %320 : i32
    %322 = arith.index_cast %321 : i32 to index
    %c0_105 = arith.constant 0 : index
    %c0_106 = arith.constant 0 : index
    %323 = vector.load %arg1[%322, %c0_105, %c0_106] : memref<8x2x32xf32, #tpu.memory_space<vmem>>, vector<1x2x32xf32>
    %324 = vector.shape_cast %323 : vector<1x2x32xf32> to vector<2x32xf32>
    %cst_107 = arith.constant dense<0.000000e+00> : vector<2x96xf32>
    %325 = tpu.matmul %324, %1, %cst_107 {dimension_numbers = #tpu.dot_dimension_numbers<[1], [0], [0], [1], [0, 0, 1, 1], [], []>} : vector<2x32xf32>, vector<32x96xf32>, vector<2x96xf32> -> vector<2x96xf32>
    %326 = vector.broadcast %5 : vector<1x96xf32> to vector<2x96xf32>
    %327 = arith.addf %325, %326 : vector<2x96xf32>
    %cst_108 = arith.constant dense<0.000000e+00> : vector<2x96xf32>
    %328 = tpu.matmul %312, %3, %cst_108 {dimension_numbers = #tpu.dot_dimension_numbers<[1], [0], [0], [1], [0, 0, 1, 1], [], []>} : vector<2x32xf32>, vector<32x96xf32>, vector<2x96xf32> -> vector<2x96xf32>
    %329 = vector.broadcast %7 : vector<1x96xf32> to vector<2x96xf32>
    %330 = arith.addf %328, %329 : vector<2x96xf32>
    %331 = vector.extract_strided_slice %327 {offsets = [0, 0], sizes = [2, 32], strides = [1, 1]} : vector<2x96xf32> to vector<2x32xf32>
    %332 = vector.extract_strided_slice %330 {offsets = [0, 0], sizes = [2, 32], strides = [1, 1]} : vector<2x96xf32> to vector<2x32xf32>
    %333 = arith.addf %331, %332 : vector<2x32xf32>
    %334 = arith.negf %333 : vector<2x32xf32>
    %335 = math.exp %334 : vector<2x32xf32>
    %cst_109 = arith.constant 1.000000e+00 : f32
    %336 = vector.broadcast %cst_109 : f32 to vector<2x32xf32>
    %337 = arith.addf %336, %335 : vector<2x32xf32>
    %338 = arith.divf %336, %337 : vector<2x32xf32>
    %339 = vector.extract_strided_slice %327 {offsets = [0, 32], sizes = [2, 32], strides = [1, 1]} : vector<2x96xf32> to vector<2x32xf32>
    %340 = vector.extract_strided_slice %330 {offsets = [0, 32], sizes = [2, 32], strides = [1, 1]} : vector<2x96xf32> to vector<2x32xf32>
    %341 = arith.addf %339, %340 : vector<2x32xf32>
    %342 = arith.negf %341 : vector<2x32xf32>
    %343 = math.exp %342 : vector<2x32xf32>
    %cst_110 = arith.constant 1.000000e+00 : f32
    %344 = vector.broadcast %cst_110 : f32 to vector<2x32xf32>
    %345 = arith.addf %344, %343 : vector<2x32xf32>
    %346 = arith.divf %344, %345 : vector<2x32xf32>
    %347 = vector.extract_strided_slice %327 {offsets = [0, 64], sizes = [2, 32], strides = [1, 1]} : vector<2x96xf32> to vector<2x32xf32>
    %348 = vector.extract_strided_slice %330 {offsets = [0, 64], sizes = [2, 32], strides = [1, 1]} : vector<2x96xf32> to vector<2x32xf32>
    %349 = arith.mulf %338, %348 : vector<2x32xf32>
    %350 = arith.addf %347, %349 : vector<2x32xf32>
    %351 = math.tanh %350 : vector<2x32xf32>
    %cst_111 = arith.constant 1.000000e+00 : f32
    %352 = vector.broadcast %cst_111 : f32 to vector<2x32xf32>
    %353 = arith.subf %352, %346 : vector<2x32xf32>
    %354 = arith.mulf %353, %351 : vector<2x32xf32>
    %355 = arith.mulf %346, %312 : vector<2x32xf32>
    %356 = arith.addf %354, %355 : vector<2x32xf32>
    %c0_112 = arith.constant 0 : index
    %357 = arith.index_cast %321 : i32 to index
    %c0_113 = arith.constant 0 : index
    %c0_114 = arith.constant 0 : index
    %358 = vector.load %arg6[%c0_112, %357, %c0_113, %c0_114] : memref<1x8x2x32xf32, #tpu.memory_space<vmem>>, vector<1x1x2x32xf32>
    %359 = vector.shape_cast %358 : vector<1x1x2x32xf32> to vector<2x32xf32>
    %360 = vector.shape_cast %356 : vector<2x32xf32> to vector<1x1x2x32xf32>
    tpu.vector_store %arg6[%c0_112, %357, %c0_113, %c0_114], %360 {strides = array<i32>} : memref<1x8x2x32xf32, #tpu.memory_space<vmem>>, vector<1x1x2x32xf32>,
    %c8_i32 = arith.constant 8 : i32
    return
  }
  func.func @transform_0(%arg0: i32) -> (i32, i32, i32) {
    %c0_i32 = arith.constant 0 : i32
    %c0_i32_0 = arith.constant 0 : i32
    %c0_i32_1 = arith.constant 0 : i32
    %c0_i32_2 = arith.constant 0 : i32
    return %c0_i32, %c0_i32_0, %c0_i32_1 : i32, i32, i32
  }
  func.func @transform_1(%arg0: i32) -> (i32, i32, i32) {
    %c0_i32 = arith.constant 0 : i32
    %c0_i32_0 = arith.constant 0 : i32
    %c0_i32_1 = arith.constant 0 : i32
    return %arg0, %c0_i32, %c0_i32_0 : i32, i32, i32
  }
  func.func @transform_2(%arg0: i32) -> (i32, i32, i32) {
    %c0_i32 = arith.constant 0 : i32
    %c0_i32_0 = arith.constant 0 : i32
    %c0_i32_1 = arith.constant 0 : i32
    return %arg0, %c0_i32, %c0_i32_0 : i32, i32, i32
  }
  func.func @transform_3(%arg0: i32) -> (i32, i32, i32) {
    %c0_i32 = arith.constant 0 : i32
    %c0_i32_0 = arith.constant 0 : i32
    %c0_i32_1 = arith.constant 0 : i32
    return %arg0, %c0_i32, %c0_i32_0 : i32, i32, i32
  }
  func.func @transform_4(%arg0: i32) -> (i32, i32, i32) {
    %c0_i32 = arith.constant 0 : i32
    %c0_i32_0 = arith.constant 0 : i32
    %c0_i32_1 = arith.constant 0 : i32
    return %arg0, %c0_i32, %c0_i32_0 : i32, i32, i32
  }
  func.func @transform_5(%arg0: i32) -> (i32, i32, i32, i32) {
    %c0_i32 = arith.constant 0 : i32
    %c0_i32_0 = arith.constant 0 : i32
    %c0_i32_1 = arith.constant 0 : i32
    %c0_i32_2 = arith.constant 0 : i32
    return %arg0, %c0_i32, %c0_i32_0, %c0_i32_1 : i32, i32, i32, i32
  }
}

</mosaic_0001>

<bundles_post_ra>
// kernel: tpu_custom_call.1
= control target key start
LH: loop header
LB: loop body
LE: loop exit
PB: predicated region body
PF: predicated region fallthrough
CT: control target
= control target key end

     0   :  { %10 = vsyncpa [#allocation3], 0  ;;  %s3221_s0 = inlined_call_operand.hbm [shape: f32[8,2,32], index: 0, kind: input, shape index: {}]   ;;  %s3222_s1 = inlined_call_operand.hbm [shape: f32[2,32,96], index: 1, kind: input, shape index: {}]   ;;  %s3223_s2 = inlined_call_operand.hbm [shape: f32[2,32,96], index: 2, kind: input, shape index: {}]   ;;  %s3224_s3 = inlined_call_operand.vmem [shape: f32[2,1,96], index: 3, kind: input, shape index: {}]   ;;  %s3225_s4 = inlined_call_operand.vmem [shape: f32[2,1,96], index: 4, kind: input, shape index: {}]   ;;  %s3226_s5 = inlined_call_operand.hbm [shape: f32[2,8,2,32], index: 5, kind: output, shape index: {}]  }
   0x1   :  { %11 = vsyncpa [#allocation6], 0 }
   0x2   :  { %13 = vsyncpa [#allocation6 + $0x1], 0 }
   0x3   :  { %14 = vsyncpa [#allocation4], 0 }
   0x4   :  { %16 = vsyncpa [#allocation4 + $0x1], 0  ;;  %s2644_s18 = smov 0   ;;  %s2646_s19 = smov 0  }
   0x5   :  { %s2648_s20 = smov 0   ;;  %s2650_s21 = smov 0  }
   0x6 LB: > { %s2665_s22 = sadd.s32 1, %s2598_s21   ;;  %s50_s23 = sadd.s32 1, %s2594_s20  ;;  %s2598_s21 = sphi %s2650_s21, %s3248_s21   ;;  %s2594_s20 = sphi %s2648_s20, %s3247_s20   ;;  %s2590_s19 = sphi %s2646_s19, %s3246_s19   ;;  %s2586_s18 = sphi %s2644_s18, %s3245_s18  }
   0x7   : > { %s47_s24 = ssub.s32 %s2598_s21, %s2665_s22  ;;  %p57_p0 = scmp.ne.s32.totalorder %s2594_s20, %s2590_s19 }
   0x8   : > { %p48_p1 = scmp.eq.s32.totalorder %s47_s24, 0  ;;  %p58_p2 = scmp.eq.s32.totalorder %s2598_s21, 0 }
   0x9   : > { %p2354_p4 = scmp.lt.s32.totalorder %s2598_s21, 2  ;;  %s204_s26 = sand.u32 1, %s2598_s21  }
   0xa   : > { %s2676_s25 = scalar_select %p48_p1, %s2594_s20, %s50_s23  }
   0xb   : > { %p59_p5 = por %p58_p2, %p57_p0  ;;  %s206_s27 = sand.u32 1, %s2594_s20  }
   0xc   : > { %s2683_s28 = sshll.u32 %s206_s27, 5  ;;  %s2069_s29 = sshll.u32 %s2598_s21, 9 }
   0xd   : > { %s2691_s7 = scalar_lea.hbm %s3222_s1, %s2069_s29  ;;  %s208_s8 = scalar_lea.vmem [#allocation5], %s2683_s28 }
   0xe   : > { %s215_s9 = sshll.u32 %s208_s8, 4  ;;  %p2694_p6 = pnand %p2354_p4, %p59_p5  ;;  %s2698_s9 = int_to_ptr.vmem [resolvable:$true] %s215_s9 }
   0xf   : > { %s2700_s11 = scalar_lea.sflag [#allocation6], %s204_s26  ;;  %s2448_s12 = scalar_lea.hbm %s2691_s7, 512 }
  0x10   : > { %p2449_p7 = scmp.ne.s32.totalorder %s2691_s7, %s2448_s12  ;;  %p2450_p8 = pneg %p2694_p6 }
  0x11   : > { %s2453_s15 = scalar_lea.hbm %s3222_s1, 1024  ;;  %p2454_p11 = scmp.lt.s32.totalorder %s2691_s7, %s3222_s1 }
  0x12   : > { %p2451_p9 = pnand %p2450_p8, %p2449_p7  ;;  %p2455_p12 = scmp.lt.s32.totalorder %s2453_s15, %s2448_s12 }
  0x14   : > { %p2452_p10 = pneg %p2451_p9  ;;  %p2456_p13 = por %p2455_p12, %p2454_p11 }
  0x16   : > { %p2457_p1 = pnand %p2456_p13, %p2452_p10 }
  0x18   : > { %2460 = shalt.err (!%p2457_p1)
}
  0x19   : > { %s2461_s23 = scalar_lea.vmem %s2698_s9, 512  ;;  %s2600_s24 = smov [#allocation5]  }
  0x1a   : > { %p2462_p2 = scmp.ne.s32.totalorder %s2698_s9, %s2461_s23  ;;  %s2466_s26 = sshll.u32 %s2600_s24, 4  ;;  %s2467_s26 = int_to_ptr.vmem [resolvable:$false] %s2466_s26 }
  0x1b   : > { %s2468_s27 = scalar_lea.vmem %s2467_s26, 1024  ;;  %p2469_p7 = scmp.lt.s32.totalorder %s2698_s9, %s2467_s26 }
  0x1c   : > { %p2464_p4 = pnand %p2462_p2, %p2450_p8  ;;  %p2470_p9 = scmp.lt.s32.totalorder %s2468_s27, %s2461_s23 }
  0x1e   : > { %p2465_p5 = pneg %p2464_p4  ;;  %p2471_p3 = por %p2470_p9, %p2469_p7 }
  0x20   : > { %p2472_p11 = pnand %p2471_p3, %p2465_p5 }
  0x22   : > { %2475 = shalt.err (!%p2472_p11)
}
  0x23   : > { %s3228_s30 = smov 128   ;;  %s2602_s6 = smov 8  }
  0x24   : > { %2345 = dma.hbm_to_vmem [thread:$0]  (!%p2694_p6), %s2691_s7, 512, %s2698_s9, %s2700_s11, %s3228_s30, %s3228_s30, %s2602_s6  }
  0x25   : > { %s2735_s13 = scalar_lea.hbm %s3223_s2, %s2069_s29  ;;  %s229_s14 = scalar_lea.vmem [#allocation7], %s2683_s28 }
  0x26   : > { %s236_s15 = sshll.u32 %s229_s14, 4  ;;  %s2739_s16 = sadd.s32 4294967295, %s2598_s21   ;;  %s2765_s15 = int_to_ptr.vmem [resolvable:$true] %s236_s15 }
  0x27   : > { %s2013_s17 = sadd.s32 4294967294, %s2598_s21   ;;  %p63_p3 = scmp.ne.s32.totalorder %s2590_s19, %s2586_s18 }
  0x28   : > { %p3227_p10 = scmp.eq.s32.totalorder %s2739_s16, 0  ;;  %p165_p12 = scmp.eq.s32.totalorder %s2739_s16, 1 }
  0x29   : > { %p171_p13 = scmp.eq.s32.totalorder %s2013_s17, 1  ;;  %p2014_p2 = scmp.ge.s32.totalorder %s2598_s21, 1 }
  0x2a   : > { %p2748_p1 = por %p3227_p10, %p63_p3  ;;  %p2756_p4 = por %p165_p12, %p57_p0 }
  0x2b   : > { %p2760_p5 = por %p171_p13, %p63_p3  ;;  %p178_p7 = scmp.lt.s32.totalorder %s2598_s21, 3 }
  0x2c   : > { %s3232_s7 = scalar_select %p2748_p1, 1, 0 }
  0x2d   : > { %s3233_s28 = scalar_select %p2756_p4, 1, 0 }
  0x2e   : > { %s3234_s29 = scalar_select %p2760_p5, 1, 0 }
  0x2f   : > { %p2767_p9 = pnand %p2014_p2, %p178_p7  ;;  %s2603_s23 = smov [#allocation2]  }
  0x30   : > { %s190_s24 = sshll.u32 %s2603_s23, 4  ;;  %s2476_s26 = scalar_lea.hbm %s2735_s13, 512  ;;  %s2773_s24 = int_to_ptr.vmem [resolvable:$true] %s190_s24 }
  0x31   : > { %p2477_p0 = scmp.ne.s32.totalorder %s2735_s13, %s2476_s26  ;;  %s2481_s12 = scalar_lea.hbm %s3223_s2, 1024 }
  0x32   : > { %p2482_p13 = scmp.lt.s32.totalorder %s2735_s13, %s3223_s2  ;;  %p2483_p2 = scmp.lt.s32.totalorder %s2481_s12, %s2476_s26 }
  0x33   : > { %p2479_p3 = pnand %p2477_p0, %p2450_p8 }
  0x34   : > { %p2484_p7 = por %p2483_p2, %p2482_p13 }
  0x35   : > { %p2480_p12 = pneg %p2479_p3 }
  0x37   : > { %p2485_p10 = pnand %p2484_p7, %p2480_p12 }
  0x39   : > { %2488 = shalt.err (!%p2485_p10)
}
  0x3a   : > { %s2489_s23 = scalar_lea.vmem %s2765_s15, 512  ;;  %s2604_s27 = smov [#allocation7]  }
  0x3b   : > { %p2490_p11 = scmp.ne.s32.totalorder %s2765_s15, %s2489_s23  ;;  %s2494_s8 = sshll.u32 %s2604_s27, 4  ;;  %s2495_s8 = int_to_ptr.vmem [resolvable:$false] %s2494_s8 }
  0x3c   : > { %s2496_s30 = scalar_lea.vmem %s2495_s8, 1024  ;;  %p2497_p5 = scmp.lt.s32.totalorder %s2765_s15, %s2495_s8 }
  0x3d   : > { %p2492_p0 = pnand %p2490_p11, %p2450_p8  ;;  %p2498_p4 = scmp.lt.s32.totalorder %s2496_s30, %s2489_s23 }
  0x3f   : > { %p2493_p3 = pneg %p2492_p0  ;;  %p2499_p1 = por %p2498_p4, %p2497_p5 }
  0x41   : > { %p2500_p13 = pnand %p2499_p1, %p2493_p3 }
  0x43   : > { %2503 = shalt.err (!%p2500_p13)
}
  0x44   : > { %s3236_s26 = smov 128   ;;  %p3237_p8 = scmp.eq.s32.totalorder %s2739_s16, 0 }
  0x45   : > { %2348 = dma.hbm_to_vmem [thread:$0]  (!%p2694_p6), %s2735_s13, 512, %s2765_s15, %s2700_s11, %s3236_s26, %s3236_s26, %s2602_s6  }
  0x46   : > { %p3238_p10 = pneg %p2767_p9  ;;  %s2515_s30 = scalar_lea.vmem %s2773_s24, 256 }
  0x47   : > { %p2516_p5 = scmp.ne.s32.totalorder %s2773_s24, %s2515_s30  ;;  %p2523_p2 = scmp.lt.s32.totalorder %s2773_s24, %s2773_s24 }
  0x48   : > { %p2339_p4 = pnand %p3238_p10, %p3237_p8  ;;  %p2524_p7 = scmp.lt.s32.totalorder %s2515_s30, %s2515_s30 }
  0x4a   : > { %p2506_p1 = pneg %p2339_p4  ;;  %p2525_p0 = por %p2524_p7, %p2523_p2 }
  0x4c   : > { %p2518_p11 = pnand %p2516_p5, %p2506_p1 }
  0x4e   : > { %p2519_p12 = pneg %p2518_p11 }
  0x50   : > { %p2526_p3 = pnand %p2525_p0, %p2519_p12 }
  0x52   : > { %2529 = shalt.err (!%p2526_p3)
}
  0x53   : > { %s2605_s10 = smov 32   ;;  %s2606_s12 = smov 2  }
  0x54   : > { %2341 = dma.hbm_to_vmem [thread:$0]  (!%p2339_p4), %s3221_s0, 256, %s2773_s24, [#allocation3], %s2605_s10, %s2605_s10, %s2606_s12  }
  0x55   : > { %260 = sbr.rel (%p2767_p9) target bundleno = 5536 (0x15a0), region = 40  ;;  %p3239_p6 = scmp.eq.s32.totalorder (!%p2767_p9), %s2739_s16, 0 }
  0x5a   : > { %2573 = dma.done.wait (%p3239_p6), [#allocation3], 256   ;;  %p3240_p13 = pmov %p3239_p6 }
  0x5b   : > { %s266_s6 = sand.u32 1, %s2739_s16   ;;  %s2822_s13 = sand.u32 1, %s2590_s19  }
  0x5c   : > { %2575 = vsyncadd (%p3240_p13), [#allocation3], 4294967040  ;;  %s2025_s15 = sshll.u32 %s2822_s13, 5  ;;  %s267_s17 = scalar_lea.sflag [#allocation6], %s266_s6 }
  0x5d   : > { %s270_s23 = scalar_lea.vmem [#allocation5], %s2025_s15  ;;  %p3241_p8 = scmp.ne.s32.totalorder %s3232_s7, 0 }
  0x5f   : > { %2577 = dma.done.wait (%p3241_p8), %s267_s17, 1024  }
  0x60   : > { %2579 = vsyncadd (%p3241_p8), %s267_s17, 4294966272  ;;  %v2607_v0 = vmov 0.0   ;;  %vm2608_vm0 = vmmov 0   ;;  %s2028_s9 = smul.u32 14, %s2739_s16  ;;  %v2836_v1 = vld [vmem:[%s270_s23 + $0x18] sm:$0xff]  ;;  %s279_s24 = scalar_lea.vmem [#allocation7], %s2025_s15 }
  0x61   : > { %2152 = vmatprep.subr.mxu0 %v2607_v0  ;;  %2163 = vmatprep.subr.mxu1 %v2607_v0  ;;  %v2838_v2 = vld [vmem:[%s279_s24 + $0x18] sm:$0xff]  ;;  %v2840_v3 = vld [vmem:[%s270_s23 + $0x10] sm:$0xff]  ;;  %v2848_v5 = vld [vmem:[%s270_s23 + $0x8] sm:$0xff]  ;;  %vm343_vm1 = vcmask 261120   ;;  %p317_p9 = scmp.lt.s32.totalorder %s2739_s16, 1  ;;  %s2609_s10 = smov 64  }
  0x62   : > { %2160 = vmatprep.mubr.msk.f32.mxu0 %vm2608_vm0, %v2607_v0  ;;  %2171 = vmatprep.mubr.msk.f32.mxu1 %vm2608_vm0, %v2607_v0  ;;  %v2844_v4 = vld [vmem:[%s279_s24 + $0x10] sm:$0xff]  ;;  %v2850_v6 = vld [vmem:[%s279_s24 + $0x8] sm:$0xff]  ;;  %v2856_v7 = vld [vmem:[%s270_s23] sm:$0xff]  ;;  %s335_s7 = scalar_lea.vmem [#allocation2], %s2028_s9  ;;  %s2610_s6 = smov 96   ;;  %vm527_vm2 = vcmask 254976  }
  0x63   : > { %2153 = vmatpush3.msra.mxu0 %v2836_v1  ;;  %2164 = vmatpush3.msra.mxu1 %v2838_v2  ;;  %v2858_v8 = vld [vmem:[%s279_s24] sm:$0xff]  ;;  %v336_v9 = vld [vmem:[%s335_s7] sm:$0x3]  ;;  %s318_s27 = scalar_select %p317_p9, %s2739_s16, 1 }
  0x64   : > { %2154 = vmatprep.subr.mxu0 %v2607_v0  ;;  %2165 = vmatprep.subr.mxu1 %v2607_v0  ;;  %s2910_s15 = smul.u32 7, %s2739_s16  ;;  %s2033_s17 = sshll.u32 %s2739_s16, 1 }
  0x65   : > { %2155 = vmatpush3.msra.mxu0 %v2840_v3  ;;  %2166 = vmatpush3.msra.mxu1 %v2844_v4  ;;  %s322_s30 = scalar_lea.vmem %s3225_s4, %s318_s27  ;;  %s319_s11 = scalar_lea.vmem %s3224_s3, %s318_s27 }
  0x66   : > { %2156 = vmatprep.subr.mxu0 %v2607_v0  ;;  %2167 = vmatprep.subr.mxu1 %v2607_v0  ;;  %v2897_v10 = vld [vmem:[%s322_s30] ss:$0 sm:$0xff]  ;;  %s2913_s23 = ssub.s32 1, %s2033_s17  ;;  %s2027_s8 = sshll.u32 %s2822_s13, 4 }
  0x67   : > { %2157 = vmatpush3.msra.mxu0 %v2848_v5  ;;  %2168 = vmatpush3.msra.mxu1 %v2850_v6  ;;  %v2904_v16 = vld [vmem:[%s319_s11] ss:$0 sm:$0xff]  ;;  %s531_s24 = sadd.s32 %s2913_s23, %s2910_s15  ;;  %s2933_s26 = scalar_lea.vmem [#allocation8], %s2027_s8 }
  0x68   : > { %2158 = vmatprep.subr.mxu0 %v2607_v0  ;;  %2169 = vmatprep.subr.mxu1 %v2607_v0  ;;  %s2917_s7 = sshll.u32 %s531_s24, 1  ;;  %s526_s30 = scalar_lea.vmem %s2933_s26, %s2028_s9 [#allocation8] }
  0x69   : > { %2159 = vmatpush3.msra.mxu0 %v2856_v7  ;;  %2170 = vmatpush3.msra.mxu1 %v2858_v8  ;;  %s533_s27 = scalar_lea.vmem [#allocation2], %s2917_s7  ;;  %s2038_s9 = sshll.u32 %s2913_s23, 1 }
  0x6a   : > { %2161 = vmatmul.mubr.msk.f32.vlgmr.msra.gmra.mxu0 %vm343_vm1, %v336_v9  ;;  %2172 = vmatmul.mubr.f32.vlgmr.msra.gmra.mxu1 %v2607_v0  ;;  %v534_v28 = vld [vmem:[%s533_s27] sm:$0x3]  ;;  %s2957_s12 = sadd.s32 %s2038_s9, %s2910_s15  ;;  %s710_s17 = scalar_lea.vmem %s2933_s26, %s2917_s7 [#allocation8] }
  0x6b   : > { %2174 = vmatprep.subr.mxu0 %v2607_v0  ;;  %2185 = vmatprep.subr.mxu1 %v2607_v0  ;;  %s2039_s14 = sshll.u32 %s2957_s12, 1  ;;  %s894_s24 = smul.u32 3, %s2913_s23 }
  0x6c   : > { %2175 = vmatpush3.msra.mxu0 %v2836_v1  ;;  %2186 = vmatpush3.msra.mxu1 %v2838_v2  ;;  %s715_s11 = scalar_lea.vmem [#allocation2], %s2039_s14  ;;  %s2047_s9 = sshll.u32 %s2913_s23, 2 }
  0x6d   : > { %2176 = vmatprep.subr.mxu0 %v2607_v0  ;;  %2187 = vmatprep.subr.mxu1 %v2607_v0  ;;  %v716_v51 = vld [vmem:[%s715_s11] sm:$0x3]  ;;  %s2995_s7 = sadd.s32 %s894_s24, %s2910_s15  ;;  %s3034_s12 = sadd.s32 %s2047_s9, %s2910_s15 }
  0x6e   : > { %2177 = vmatpush3.msra.mxu0 %v2840_v3  ;;  %2188 = vmatpush3.msra.mxu1 %v2844_v4  ;;  %s2043_s27 = sshll.u32 %s2995_s7, 1  ;;  %s1258_s24 = smul.u32 5, %s2913_s23 }
  0x6f   : > { %2178 = vmatprep.subr.mxu0 %v2607_v0  ;;  %2189 = vmatprep.subr.mxu1 %v2607_v0  ;;  %s897_s8 = scalar_lea.vmem [#allocation2], %s2043_s27  ;;  %s1440_s9 = smul.u32 6, %s2913_s23 }
  0x70   : > { %2179 = vmatpush3.msra.mxu0 %v2848_v5  ;;  %2190 = vmatpush3.msra.mxu1 %v2850_v6  ;;  %s3073_s7 = sadd.s32 %s1258_s24, %s2910_s15  ;;  %s1622_s24 = smul.u32 7, %s2913_s23 }
  0x71   : > { %2180 = vmatprep.subr.mxu0 %v2607_v0  ;;  %2191 = vmatprep.subr.mxu1 %v2607_v0  ;;  %s2071_s23 = sshll.u32 %s2739_s16, 8  ;;  %p3242_p4 = scmp.ne.s32.totalorder %s3233_s28, 0 }
  0x72   : > { %2181 = vmatpush3.msra.mxu0 %v2856_v7  ;;  %2182 = vmatprep.mubr.msk.f32.mxu0 %vm2608_vm0, %v2607_v0  ;;  %s2611_s16 = smov [#allocation8]  }
  0x73   : > { %2192 = vmatpush3.msra.mxu1 %v2858_v8  ;;  %2193 = vmatprep.mubr.msk.f32.mxu1 %vm2608_vm0, %v2607_v0 }
  0x74   : > { %2196 = vmatprep.subr.mxu0 %v2607_v0  ;;  %2207 = vmatprep.subr.mxu1 %v2607_v0 }
  0x75   : > { %2183 = vmatmul.mubr.msk.f32.vlgmr.msra.gmra.mxu0 %vm343_vm1, %v534_v28 }
  0x76   : > { %2197 = vmatpush3.msra.mxu0 %v2836_v1  ;;  %2204 = vmatprep.mubr.msk.f32.mxu0 %vm2608_vm0, %v2607_v0 }
  0x77   : > { %2198 = vmatprep.subr.mxu0 %v2607_v0 }
  0x78   : > { %2199 = vmatpush3.msra.mxu0 %v2840_v3 }
  0x79   : > { %2200 = vmatprep.subr.mxu0 %v2607_v0 }
  0x7a   : > { %2201 = vmatpush3.msra.mxu0 %v2848_v5 }
  0x7b   : > { %2202 = vmatprep.subr.mxu0 %v2607_v0 }
  0x7c   : > { %2203 = vmatpush3.msra.mxu0 %v2856_v7 }
  0x7d   : > { %2218 = vmatprep.subr.mxu0 %v2607_v0  ;;  %2205 = vmatmul.mubr.msk.f32.vlgmr.msra.gmra.mxu0 %vm343_vm1, %v716_v51 }
  0x7e   : > { %2219 = vmatpush3.msra.mxu0 %v2836_v1  ;;  %2226 = vmatprep.mubr.msk.f32.mxu0 %vm2608_vm0, %v2607_v0 }
  0x7f   : > { %2220 = vmatprep.subr.mxu0 %v2607_v0 }
  0x80   : > { %2221 = vmatpush3.msra.mxu0 %v2840_v3 }
  0x81   : > { %2222 = vmatprep.subr.mxu0 %v2607_v0 }
  0x82   : > { %2223 = vmatpush3.msra.mxu0 %v2848_v5 }
  0x83   : > { %2224 = vmatprep.subr.mxu0 %v2607_v0 }
  0x84   : > { %2225 = vmatpush3.msra.mxu0 %v2856_v7 }
  0x85   : > { %2240 = vmatprep.subr.mxu0 %v2607_v0 }
 0x12a   : > { %v413_v11 = vpop.f32.mrf.mxu0  ;;  %v492_v12 = vpop.f32.mrf.mxu1 }
 0x12b   : > { %v493_v13 = vadd.f32 %v2897_v10, %v492_v12  ;;  %v414_v17 = vadd.f32 %v2904_v16, %v413_v11 }
 0x12c   : > { %v2173_v14 = vpop.f32.mrf.mxu1  ;;  %v2162_v15 = vpop.f32.mrf.mxu0 }
 0x12d   : > { %504 = vrot.lane.b32.xlu0 %v493_v13, %s2609_s10  ;;  %v496_v18 = vadd.f32 %v493_v13, %v414_v17 }
 0x12f   : > { %v2032_v19 = vmul.f32 -1.442695, %v496_v18 }
 0x131   : > { %2400 = vpow2.f32 %v2032_v19 }
 0x135   : > { %v604_v35 = vpop.f32.mrf.mxu0 }
 0x136   : > { %v605_v40 = vadd.f32 %v2904_v16, %v604_v35 }
 0x137   : > { %v2184_v36 = vpop.f32.mrf.mxu0 }
 0x13d   : > { %v786_v58 = vpop.f32.mrf.mxu0 }
 0x13e   : > { %v2401_v20 = vpop.eup %2400  ;;  %v787_v63 = vadd.f32 %v2904_v16, %v786_v58 }
 0x13f   : > { %v500_v21 = vadd.f32 1.0, %v2401_v20  ;;  %v2206_v59 = vpop.f32.mrf.mxu0 }
 0x141   : > { %2402 = vrcp.f32 %v500_v21  ;;  %v898_v21 = vld [vmem:[%s897_s8] sm:$0x3] }
 0x142   : > { %2227 = vmatmul.mubr.msk.f32.vlgmr.msra.gmra.mxu0 %vm343_vm1, %v898_v21 }
 0x143   : > { %2241 = vmatpush3.msra.mxu0 %v2836_v1  ;;  %2248 = vmatprep.mubr.msk.f32.mxu0 %vm2608_vm0, %v2607_v0 }
 0x144   : > { %2242 = vmatprep.subr.mxu0 %v2607_v0 }
 0x145   : > { %2243 = vmatpush3.msra.mxu0 %v2840_v3 }
 0x146   : > { %2244 = vmatprep.subr.mxu0 %v2607_v0 }
 0x147   : > { %2245 = vmatpush3.msra.mxu0 %v2848_v5 }
 0x148   : > { %2246 = vmatprep.subr.mxu0 %v2607_v0 }
 0x149   : > { %2247 = vmatpush3.msra.mxu0 %v2856_v7 }
 0x14a   : > { %2262 = vmatprep.subr.mxu0 %v2607_v0 }
 0x14e   : > { %v2403_v22 = vpop.eup %2402 }
 0x14f   : > { %v514_v29 = vsub.f32 1.0, %v2403_v22  ;;  %v520_v31 = vmul.f32 0.0, %v2403_v22 }
 0x19f   : > { %v505_v23 = vpop.permute.xlu0 %504 }
 0x1a0   : > { %v507_v24 = vmul.f32 %v2403_v22, %v505_v23 }
 0x1a2   : > { %509 = vrot.lane.b32.xlu0 %v507_v24, %s2609_s10 }
 0x202   : > { %v968_v28 = vpop.f32.mrf.mxu0 }
 0x214   : > { %v510_v25 = vpop.permute.xlu0 %509 }
 0x215   : > { %v512_v26 = vadd.f32 %v510_v25, %v414_v17 }
 0x217   : > { %2404 = vtanh.f32 %v512_v26 }
 0x224   : > { %v2405_v27 = vpop.eup %2404 }
 0x225   : > { %516 = vrot.lane.b32.xlu1 %v2405_v27, %s2610_s6 }
 0x297   : > { %v517_v30 = vpop.permute.xlu1 %516 }
 0x298   : > { %v519_v32 = vmul.f32 %v517_v30, %v514_v29  ;;  %v2228_v29 = vpop.f32.mrf.mxu0 }
 0x29a   : > { %v521_v33 = vadd.f32 %v520_v31, %v519_v32 }
 0x29c   : > { %523 = vrot.lane.b32.xlu1 %v521_v33, %s2610_s6 }
 0x30e   : > { %v524_v34 = vpop.permute.xlu1 %523 }
 0x30f   : > { %528 = vst.msk [vmem:[%s526_s30] sm:$0x3] %vm527_vm2, %v524_v34  ;;  %2194 = vmatmul.mubr.msk.f32.vlgmr.msra.gmra.mxu1 %vm343_vm1, %v524_v34  ;;  %s892_s30 = scalar_lea.vmem %s2933_s26, %s2039_s14 [#allocation8]  ;;  %s2048_s14 = sshll.u32 %s3034_s12, 1 }
 0x310   : > { %2208 = vmatpush3.msra.mxu1 %v2838_v2  ;;  %2215 = vmatprep.mubr.msk.f32.mxu1 %vm2608_vm0, %v2607_v0  ;;  %s1079_s11 = scalar_lea.vmem [#allocation2], %s2048_s14  ;;  %s3112_s12 = sadd.s32 %s1440_s9, %s2910_s15 }
 0x311   : > { %2209 = vmatprep.subr.mxu1 %v2607_v0 }
 0x312   : > { %2210 = vmatpush3.msra.mxu1 %v2844_v4 }
 0x313   : > { %2211 = vmatprep.subr.mxu1 %v2607_v0 }
 0x314   : > { %2212 = vmatpush3.msra.mxu1 %v2850_v6 }
 0x315   : > { %2213 = vmatprep.subr.mxu1 %v2607_v0 }
 0x316   : > { %2214 = vmatpush3.msra.mxu1 %v2858_v8 }
 0x317   : > { %2229 = vmatprep.subr.mxu1 %v2607_v0 }
 0x3cf   : > { %v676_v37 = vpop.f32.mrf.mxu1 }
 0x3d0   : > { %v677_v38 = vadd.f32 %v2897_v10, %v676_v37 }
 0x3d1   : > { %v2195_v39 = vpop.f32.mrf.mxu1 }
 0x3d2   : > { %688 = vrot.lane.b32.xlu0 %v677_v38, %s2609_s10  ;;  %v680_v41 = vadd.f32 %v677_v38, %v605_v40 }
 0x3d4   : > { %v2037_v42 = vmul.f32 -1.442695, %v680_v41 }
 0x3d6   : > { %2406 = vpow2.f32 %v2037_v42 }
 0x3e3   : > { %v2407_v43 = vpop.eup %2406 }
 0x3e4   : > { %v684_v44 = vadd.f32 1.0, %v2407_v43 }
 0x3e6   : > { %2408 = vrcp.f32 %v684_v44  ;;  %v1080_v44 = vld [vmem:[%s1079_s11] sm:$0x3] }
 0x3e7   : > { %2249 = vmatmul.mubr.msk.f32.vlgmr.msra.gmra.mxu0 %vm343_vm1, %v1080_v44 }
 0x3e8   : > { %2263 = vmatpush3.msra.mxu0 %v2836_v1  ;;  %2270 = vmatprep.mubr.msk.f32.mxu0 %vm2608_vm0, %v2607_v0 }
 0x3e9   : > { %2264 = vmatprep.subr.mxu0 %v2607_v0 }
 0x3ea   : > { %2265 = vmatpush3.msra.mxu0 %v2840_v3 }
 0x3eb   : > { %2266 = vmatprep.subr.mxu0 %v2607_v0 }
 0x3ec   : > { %2267 = vmatpush3.msra.mxu0 %v2848_v5 }
 0x3ed   : > { %2268 = vmatprep.subr.mxu0 %v2607_v0 }
 0x3ee   : > { %2269 = vmatpush3.msra.mxu0 %v2856_v7 }
 0x3ef   : > { %2284 = vmatprep.subr.mxu0 %v2607_v0 }
 0x3f3   : > { %v2409_v45 = vpop.eup %2408 }
 0x3f4   : > { %v698_v52 = vsub.f32 1.0, %v2409_v45  ;;  %v704_v54 = vmul.f32 %v2409_v45, %v521_v33  ;;  %v969_v33 = vadd.f32 %v2904_v16, %v968_v28 }
 0x444   : > { %v689_v46 = vpop.permute.xlu0 %688 }
 0x445   : > { %v691_v47 = vmul.f32 %v2409_v45, %v689_v46 }
 0x447   : > { %693 = vrot.lane.b32.xlu1 %v691_v47, %s2609_s10 }
 0x4a7   : > { %v1150_v51 = vpop.f32.mrf.mxu0 }
 0x4b9   : > { %v694_v48 = vpop.permute.xlu1 %693 }
 0x4ba   : > { %v696_v49 = vadd.f32 %v694_v48, %v605_v40 }
 0x4bc   : > { %2410 = vtanh.f32 %v696_v49 }
 0x4c9   : > { %v2411_v50 = vpop.eup %2410 }
 0x4ca   : > { %700 = vrot.lane.b32.xlu0 %v2411_v50, %s2610_s6 }
 0x53c   : > { %v701_v53 = vpop.permute.xlu0 %700 }
 0x53d   : > { %v703_v55 = vmul.f32 %v701_v53, %v698_v52  ;;  %v2250_v52 = vpop.f32.mrf.mxu0 }
 0x53f   : > { %v705_v56 = vadd.f32 %v704_v54, %v703_v55 }
 0x541   : > { %707 = vrot.lane.b32.xlu1 %v705_v56, %s2610_s6 }
 0x5b3   : > { %v708_v57 = vpop.permute.xlu1 %707 }
 0x5b4   : > { %711 = vst.msk [vmem:[%s710_s17] sm:$0x3] %vm527_vm2, %v708_v57  ;;  %2216 = vmatmul.mubr.msk.f32.vlgmr.msra.gmra.mxu1 %vm343_vm1, %v708_v57  ;;  %s1074_s17 = scalar_lea.vmem %s2933_s26, %s2043_s27 [#allocation8]  ;;  %s2052_s27 = sshll.u32 %s3073_s7, 1 }
 0x5b5   : > { %2230 = vmatpush3.msra.mxu1 %v2838_v2  ;;  %2237 = vmatprep.mubr.msk.f32.mxu1 %vm2608_vm0, %v2607_v0  ;;  %s1261_s8 = scalar_lea.vmem [#allocation2], %s2052_s27  ;;  %s3149_s7 = sadd.s32 %s1622_s24, %s2910_s15 }
 0x5b6   : > { %2231 = vmatprep.subr.mxu1 %v2607_v0  ;;  %s1818_s15 = sshll.u32 %s2933_s26, 4  ;;  %s3169_s15 = int_to_ptr.vmem [resolvable:$true] %s1818_s15 }
 0x5b7   : > { %2232 = vmatpush3.msra.mxu1 %v2844_v4 }
 0x5b8   : > { %2233 = vmatprep.subr.mxu1 %v2607_v0 }
 0x5b9   : > { %2234 = vmatpush3.msra.mxu1 %v2850_v6 }
 0x5ba   : > { %2235 = vmatprep.subr.mxu1 %v2607_v0 }
 0x5bb   : > { %2236 = vmatpush3.msra.mxu1 %v2858_v8 }
 0x5bc   : > { %2251 = vmatprep.subr.mxu1 %v2607_v0 }
 0x674   : > { %v858_v60 = vpop.f32.mrf.mxu1 }
 0x675   : > { %v859_v61 = vadd.f32 %v2897_v10, %v858_v60 }
 0x676   : > { %v2217_v62 = vpop.f32.mrf.mxu1 }
 0x677   : > { %870 = vrot.lane.b32.xlu0 %v859_v61, %s2609_s10  ;;  %v862_v9 = vadd.f32 %v859_v61, %v787_v63 }
 0x679   : > { %v2042_v11 = vmul.f32 -1.442695, %v862_v9 }
 0x67b   : > { %2412 = vpow2.f32 %v2042_v11 }
 0x688   : > { %v2413_v12 = vpop.eup %2412 }
 0x689   : > { %v866_v13 = vadd.f32 1.0, %v2413_v12 }
 0x68b   : > { %2414 = vrcp.f32 %v866_v13  ;;  %v1262_v13 = vld [vmem:[%s1261_s8] sm:$0x3] }
 0x68c   : > { %2271 = vmatmul.mubr.msk.f32.vlgmr.msra.gmra.mxu0 %vm343_vm1, %v1262_v13 }
 0x68d   : > { %2285 = vmatpush3.msra.mxu0 %v2836_v1  ;;  %2292 = vmatprep.mubr.msk.f32.mxu0 %vm2608_vm0, %v2607_v0 }
 0x68e   : > { %2286 = vmatprep.subr.mxu0 %v2607_v0 }
 0x68f   : > { %2287 = vmatpush3.msra.mxu0 %v2840_v3 }
 0x690   : > { %2288 = vmatprep.subr.mxu0 %v2607_v0 }
 0x691   : > { %2289 = vmatpush3.msra.mxu0 %v2848_v5 }
 0x692   : > { %2290 = vmatprep.subr.mxu0 %v2607_v0 }
 0x693   : > { %2291 = vmatpush3.msra.mxu0 %v2856_v7 }
 0x694   : > { %2306 = vmatprep.subr.mxu0 %v2607_v0 }
 0x698   : > { %v2415_v14 = vpop.eup %2414 }
 0x699   : > { %v880_v22 = vsub.f32 1.0, %v2415_v14  ;;  %v886_v24 = vmul.f32 %v2415_v14, %v705_v56  ;;  %v1151_v56 = vadd.f32 %v2904_v16, %v1150_v51 }
 0x6e9   : > { %v871_v15 = vpop.permute.xlu0 %870 }
 0x6ea   : > { %v873_v17 = vmul.f32 %v2415_v14, %v871_v15 }
 0x6ec   : > { %875 = vrot.lane.b32.xlu1 %v873_v17, %s2609_s10 }
 0x74c   : > { %v1332_v21 = vpop.f32.mrf.mxu0 }
 0x75e   : > { %v876_v18 = vpop.permute.xlu1 %875 }
 0x75f   : > { %v878_v19 = vadd.f32 %v876_v18, %v787_v63 }
 0x761   : > { %2416 = vtanh.f32 %v878_v19 }
 0x76e   : > { %v2417_v20 = vpop.eup %2416 }
 0x76f   : > { %882 = vrot.lane.b32.xlu0 %v2417_v20, %s2610_s6 }
 0x7e1   : > { %v883_v23 = vpop.permute.xlu0 %882 }
 0x7e2   : > { %v885_v25 = vmul.f32 %v883_v23, %v880_v22  ;;  %v2272_v22 = vpop.f32.mrf.mxu0 }
 0x7e4   : > { %v887_v26 = vadd.f32 %v886_v24, %v885_v25 }
 0x7e6   : > { %889 = vrot.lane.b32.xlu1 %v887_v26, %s2610_s6 }
 0x858   : > { %v890_v27 = vpop.permute.xlu1 %889 }
 0x859   : > { %893 = vst.msk [vmem:[%s892_s30] sm:$0x3] %vm527_vm2, %v890_v27  ;;  %2238 = vmatmul.mubr.msk.f32.vlgmr.msra.gmra.mxu1 %vm343_vm1, %v890_v27  ;;  %s1256_s30 = scalar_lea.vmem %s2933_s26, %s2048_s14 [#allocation8]  ;;  %s2056_s14 = sshll.u32 %s3112_s12, 1 }
 0x85a   : > { %2252 = vmatpush3.msra.mxu1 %v2838_v2  ;;  %2259 = vmatprep.mubr.msk.f32.mxu1 %vm2608_vm0, %v2607_v0  ;;  %s1443_s11 = scalar_lea.vmem [#allocation2], %s2056_s14 }
 0x85b   : > { %2253 = vmatprep.subr.mxu1 %v2607_v0 }
 0x85c   : > { %2254 = vmatpush3.msra.mxu1 %v2844_v4 }
 0x85d   : > { %2255 = vmatprep.subr.mxu1 %v2607_v0 }
 0x85e   : > { %2256 = vmatpush3.msra.mxu1 %v2850_v6 }
 0x85f   : > { %2257 = vmatprep.subr.mxu1 %v2607_v0 }
 0x860   : > { %2258 = vmatpush3.msra.mxu1 %v2858_v8 }
 0x861   : > { %2273 = vmatprep.subr.mxu1 %v2607_v0 }
 0x919   : > { %v1040_v30 = vpop.f32.mrf.mxu1 }
 0x91a   : > { %v1041_v31 = vadd.f32 %v2897_v10, %v1040_v30 }
 0x91b   : > { %v2239_v32 = vpop.f32.mrf.mxu1 }
 0x91c   : > { %1052 = vrot.lane.b32.xlu0 %v1041_v31, %s2609_s10  ;;  %v1044_v34 = vadd.f32 %v1041_v31, %v969_v33 }
 0x91e   : > { %v2046_v35 = vmul.f32 -1.442695, %v1044_v34 }
 0x920   : > { %2418 = vpow2.f32 %v2046_v35 }
 0x92d   : > { %v2419_v36 = vpop.eup %2418 }
 0x92e   : > { %v1048_v37 = vadd.f32 1.0, %v2419_v36 }
 0x930   : > { %2420 = vrcp.f32 %v1048_v37  ;;  %v1444_v37 = vld [vmem:[%s1443_s11] sm:$0x3]  ;;  %s1805_s11 = scalar_lea.sflag [#allocation4], %s2822_s13 }
 0x931   : > { %2293 = vmatmul.mubr.msk.f32.vlgmr.msra.gmra.mxu0 %vm343_vm1, %v1444_v37 }
 0x932   : > { %2307 = vmatpush3.msra.mxu0 %v2836_v1  ;;  %2314 = vmatprep.mubr.msk.f32.mxu0 %vm2608_vm0, %v2607_v0 }
 0x933   : > { %2308 = vmatprep.subr.mxu0 %v2607_v0 }
 0x934   : > { %2309 = vmatpush3.msra.mxu0 %v2840_v3 }
 0x935   : > { %2310 = vmatprep.subr.mxu0 %v2607_v0 }
 0x936   : > { %2311 = vmatpush3.msra.mxu0 %v2848_v5 }
 0x937   : > { %2312 = vmatprep.subr.mxu0 %v2607_v0 }
 0x938   : > { %2313 = vmatpush3.msra.mxu0 %v2856_v7 }
 0x93d   : > { %v2421_v38 = vpop.eup %2420 }
 0x93e   : > { %v1062_v45 = vsub.f32 1.0, %v2421_v38  ;;  %v1068_v47 = vmul.f32 %v2421_v38, %v887_v26  ;;  %v1333_v26 = vadd.f32 %v2904_v16, %v1332_v21 }
 0x98e   : > { %v1053_v39 = vpop.permute.xlu0 %1052 }
 0x98f   : > { %v1055_v40 = vmul.f32 %v2421_v38, %v1053_v39 }
 0x991   : > { %1057 = vrot.lane.b32.xlu1 %v1055_v40, %s2609_s10 }
 0x9f1   : > { %v1514_v3 = vpop.f32.mrf.mxu0 }
 0x9f2   : > { %v1515_v44 = vadd.f32 %v2904_v16, %v1514_v3 }
 0x9f3   : > { %v2294_v5 = vpop.f32.mrf.mxu0 }
 0xa03   : > { %v1058_v41 = vpop.permute.xlu1 %1057 }
 0xa04   : > { %v1060_v42 = vadd.f32 %v1058_v41, %v969_v33 }
 0xa06   : > { %2422 = vtanh.f32 %v1060_v42 }
 0xa13   : > { %v2423_v43 = vpop.eup %2422 }
 0xa14   : > { %1064 = vrot.lane.b32.xlu0 %v2423_v43, %s2610_s6 }
 0xa86   : > { %v1065_v46 = vpop.permute.xlu0 %1064 }
 0xa87   : > { %v1067_v48 = vmul.f32 %v1065_v46, %v1062_v45 }
 0xa89   : > { %v1069_v49 = vadd.f32 %v1068_v47, %v1067_v48 }
 0xa8b   : > { %1071 = vrot.lane.b32.xlu1 %v1069_v49, %s2610_s6 }
 0xafd   : > { %v1072_v50 = vpop.permute.xlu1 %1071 }
 0xafe   : > { %1075 = vst.msk [vmem:[%s1074_s17] sm:$0x3] %vm527_vm2, %v1072_v50  ;;  %2260 = vmatmul.mubr.msk.f32.vlgmr.msra.gmra.mxu1 %vm343_vm1, %v1072_v50  ;;  %s1438_s17 = scalar_lea.vmem %s2933_s26, %s2052_s27 [#allocation8]  ;;  %s2060_s27 = sshll.u32 %s3149_s7, 1 }
 0xaff   : > { %2274 = vmatpush3.msra.mxu1 %v2838_v2  ;;  %2281 = vmatprep.mubr.msk.f32.mxu1 %vm2608_vm0, %v2607_v0  ;;  %s1625_s8 = scalar_lea.vmem [#allocation2], %s2060_s27 }
 0xb00   : > { %2275 = vmatprep.subr.mxu1 %v2607_v0  ;;  %v1626_v51 = vld [vmem:[%s1625_s8] sm:$0x3] }
 0xb01   : > { %2276 = vmatpush3.msra.mxu1 %v2844_v4  ;;  %2315 = vmatmul.mubr.msk.f32.vlgmr.msra.gmra.mxu0 %vm343_vm1, %v1626_v51 }
 0xb02   : > { %2277 = vmatprep.subr.mxu1 %v2607_v0 }
 0xb03   : > { %2278 = vmatpush3.msra.mxu1 %v2850_v6 }
 0xb04   : > { %2279 = vmatprep.subr.mxu1 %v2607_v0 }
 0xb05   : > { %2280 = vmatpush3.msra.mxu1 %v2858_v8 }
 0xb06   : > { %2295 = vmatprep.subr.mxu1 %v2607_v0 }
 0xbbe   : > { %v1222_v53 = vpop.f32.mrf.mxu1 }
 0xbbf   : > { %v1223_v54 = vadd.f32 %v2897_v10, %v1222_v53 }
 0xbc0   : > { %v2261_v55 = vpop.f32.mrf.mxu1 }
 0xbc1   : > { %1234 = vrot.lane.b32.xlu0 %v1223_v54, %s2609_s10  ;;  %v1226_v57 = vadd.f32 %v1223_v54, %v1151_v56 }
 0xbc3   : > { %v2051_v58 = vmul.f32 -1.442695, %v1226_v57 }
 0xbc5   : > { %2424 = vpow2.f32 %v2051_v58  ;;  %v1696_v58 = vpop.f32.mrf.mxu0 }
 0xbd2   : > { %v2425_v59 = vpop.eup %2424 }
 0xbd3   : > { %v1230_v60 = vadd.f32 1.0, %v2425_v59  ;;  %v2316_v59 = vpop.f32.mrf.mxu0 }
 0xbd5   : > { %2426 = vrcp.f32 %v1230_v60 }
 0xbe2   : > { %v2427_v61 = vpop.eup %2426 }
 0xbe3   : > { %v1244_v14 = vsub.f32 1.0, %v2427_v61  ;;  %v1250_v17 = vmul.f32 %v2427_v61, %v1069_v49 }
 0xc33   : > { %v1235_v62 = vpop.permute.xlu0 %1234 }
 0xc34   : > { %v1237_v63 = vmul.f32 %v2427_v61, %v1235_v62 }
 0xc36   : > { %1239 = vrot.lane.b32.xlu1 %v1237_v63, %s2609_s10  ;;  %v1697_v63 = vadd.f32 %v2904_v16, %v1696_v58 }
 0xca8   : > { %v1240_v9 = vpop.permute.xlu1 %1239 }
 0xca9   : > { %v1242_v11 = vadd.f32 %v1240_v9, %v1151_v56 }
 0xcab   : > { %2428 = vtanh.f32 %v1242_v11 }
 0xcb8   : > { %v2429_v12 = vpop.eup %2428 }
 0xcb9   : > { %1246 = vrot.lane.b32.xlu0 %v2429_v12, %s2610_s6 }
 0xd2b   : > { %v1247_v15 = vpop.permute.xlu0 %1246 }
 0xd2c   : > { %v1249_v18 = vmul.f32 %v1247_v15, %v1244_v14 }
 0xd2e   : > { %v1251_v19 = vadd.f32 %v1250_v17, %v1249_v18 }
 0xd30   : > { %1253 = vrot.lane.b32.xlu1 %v1251_v19, %s2610_s6 }
 0xda2   : > { %v1254_v20 = vpop.permute.xlu1 %1253 }
 0xda3   : > { %1257 = vst.msk [vmem:[%s1256_s30] sm:$0x3] %vm527_vm2, %v1254_v20  ;;  %2282 = vmatmul.mubr.msk.f32.vlgmr.msra.gmra.mxu1 %vm343_vm1, %v1254_v20  ;;  %s1620_s30 = scalar_lea.vmem %s2933_s26, %s2056_s14 [#allocation8]  ;;  %s3177_s14 = scalar_lea.hbm %s3226_s5, %s2071_s23 }
 0xda4   : > { %2296 = vmatpush3.msra.mxu1 %v2838_v2  ;;  %2303 = vmatprep.mubr.msk.f32.mxu1 %vm2608_vm0, %v2607_v0 }
 0xda5   : > { %2297 = vmatprep.subr.mxu1 %v2607_v0 }
 0xda6   : > { %2298 = vmatpush3.msra.mxu1 %v2844_v4 }
 0xda7   : > { %2299 = vmatprep.subr.mxu1 %v2607_v0 }
 0xda8   : > { %2300 = vmatpush3.msra.mxu1 %v2850_v6 }
 0xda9   : > { %2301 = vmatprep.subr.mxu1 %v2607_v0 }
 0xdaa   : > { %2302 = vmatpush3.msra.mxu1 %v2858_v8 }
 0xdab   : > { %2317 = vmatprep.subr.mxu1 %v2607_v0 }
 0xe63   : > { %v1404_v23 = vpop.f32.mrf.mxu1 }
 0xe64   : > { %v1405_v24 = vadd.f32 %v2897_v10, %v1404_v23 }
 0xe65   : > { %v2283_v25 = vpop.f32.mrf.mxu1 }
 0xe66   : > { %1416 = vrot.lane.b32.xlu0 %v1405_v24, %s2609_s10  ;;  %v1408_v27 = vadd.f32 %v1405_v24, %v1333_v26 }
 0xe68   : > { %v2055_v28 = vmul.f32 -1.442695, %v1408_v27 }
 0xe6a   : > { %2430 = vpow2.f32 %v2055_v28 }
 0xe77   : > { %v2431_v29 = vpop.eup %2430 }
 0xe78   : > { %v1412_v30 = vadd.f32 1.0, %v2431_v29 }
 0xe7a   : > { %2432 = vrcp.f32 %v1412_v30 }
 0xe87   : > { %v2433_v31 = vpop.eup %2432 }
 0xe88   : > { %v1426_v38 = vsub.f32 1.0, %v2433_v31  ;;  %v1432_v40 = vmul.f32 %v2433_v31, %v1251_v19 }
 0xed8   : > { %v1417_v32 = vpop.permute.xlu0 %1416 }
 0xed9   : > { %v1419_v33 = vmul.f32 %v2433_v31, %v1417_v32 }
 0xedb   : > { %1421 = vrot.lane.b32.xlu1 %v1419_v33, %s2609_s10 }
 0xf4d   : > { %v1422_v34 = vpop.permute.xlu1 %1421 }
 0xf4e   : > { %v1424_v35 = vadd.f32 %v1422_v34, %v1333_v26 }
 0xf50   : > { %2434 = vtanh.f32 %v1424_v35 }
 0xf5d   : > { %v2435_v36 = vpop.eup %2434 }
 0xf5e   : > { %1428 = vrot.lane.b32.xlu0 %v2435_v36, %s2610_s6 }
 0xfd0   : > { %v1429_v39 = vpop.permute.xlu0 %1428 }
 0xfd1   : > { %v1431_v41 = vmul.f32 %v1429_v39, %v1426_v38 }
 0xfd3   : > { %v1433_v1 = vadd.f32 %v1432_v40, %v1431_v41 }
 0xfd5   : > { %1435 = vrot.lane.b32.xlu1 %v1433_v1, %s2610_s6 }
0x1047   : > { %v1436_v42 = vpop.permute.xlu1 %1435 }
0x1048   : > { %1439 = vst.msk [vmem:[%s1438_s17] sm:$0x3] %vm527_vm2, %v1436_v42  ;;  %2304 = vmatmul.mubr.msk.f32.vlgmr.msra.gmra.mxu1 %vm343_vm1, %v1436_v42  ;;  %s2530_s17 = scalar_lea.vmem %s3169_s15, 256 }
0x1049   : > { %2318 = vmatpush3.msra.mxu1 %v2838_v2  ;;  %2325 = vmatprep.mubr.msk.f32.mxu1 %vm2608_vm0, %v2607_v0  ;;  %p2531_p10 = scmp.ne.s32.totalorder %s3169_s15, %s2530_s17 }
0x104a   : > { %2319 = vmatprep.subr.mxu1 %v2607_v0 }
0x104b   : > { %2320 = vmatpush3.msra.mxu1 %v2844_v4  ;;  %p2532_p1 = pnand %p2531_p10, %p3242_p4 }
0x104c   : > { %2321 = vmatprep.subr.mxu1 %v2607_v0 }
0x104d   : > { %2322 = vmatpush3.msra.mxu1 %v2850_v6  ;;  %p2533_p5 = pneg %p2532_p1 }
0x104e   : > { %2323 = vmatprep.subr.mxu1 %v2607_v0 }
0x104f   : > { %2324 = vmatpush3.msra.mxu1 %v2858_v8 }
0x1108   : > { %v1586_v7 = vpop.f32.mrf.mxu1 }
0x1109   : > { %v1587_v2 = vadd.f32 %v2897_v10, %v1586_v7 }
0x110a   : > { %v2305_v43 = vpop.f32.mrf.mxu1 }
0x110b   : > { %1598 = vrot.lane.b32.xlu0 %v1587_v2, %s2609_s10  ;;  %v1590_v4 = vadd.f32 %v1587_v2, %v1515_v44 }
0x110d   : > { %v2059_v45 = vmul.f32 -1.442695, %v1590_v4 }
0x110f   : > { %2436 = vpow2.f32 %v2059_v45 }
0x111c   : > { %v2437_v6 = vpop.eup %2436 }
0x111d   : > { %v1594_v46 = vadd.f32 1.0, %v2437_v6 }
0x111f   : > { %2438 = vrcp.f32 %v1594_v46 }
0x112c   : > { %v2439_v0 = vpop.eup %2438 }
0x112d   : > { %v1608_v52 = vsub.f32 1.0, %v2439_v0  ;;  %v1614_v54 = vmul.f32 %v2439_v0, %v1433_v1 }
0x117d   : > { %v1599_v8 = vpop.permute.xlu0 %1598 }
0x117e   : > { %v1601_v47 = vmul.f32 %v2439_v0, %v1599_v8 }
0x1180   : > { %1603 = vrot.lane.b32.xlu1 %v1601_v47, %s2609_s10 }
0x11f2   : > { %v1604_v48 = vpop.permute.xlu1 %1603 }
0x11f3   : > { %v1606_v49 = vadd.f32 %v1604_v48, %v1515_v44 }
0x11f5   : > { %2440 = vtanh.f32 %v1606_v49 }
0x1202   : > { %v2441_v50 = vpop.eup %2440 }
0x1203   : > { %1610 = vrot.lane.b32.xlu0 %v2441_v50, %s2610_s6 }
0x1275   : > { %v1611_v53 = vpop.permute.xlu0 %1610 }
0x1276   : > { %v1613_v55 = vmul.f32 %v1611_v53, %v1608_v52 }
0x1278   : > { %v1615_v56 = vadd.f32 %v1614_v54, %v1613_v55 }
0x127a   : > { %1617 = vrot.lane.b32.xlu1 %v1615_v56, %s2610_s6 }
0x12ec   : > { %v1618_v57 = vpop.permute.xlu1 %1617 }
0x12ed   : > { %1621 = vst.msk [vmem:[%s1620_s30] sm:$0x3] %vm527_vm2, %v1618_v57  ;;  %2326 = vmatmul.mubr.msk.f32.vlgmr.msra.gmra.mxu1 %vm343_vm1, %v1618_v57 }
0x13ad   : > { %v1768_v60 = vpop.f32.mrf.mxu1 }
0x13ae   : > { %v1769_v61 = vadd.f32 %v2897_v10, %v1768_v60 }
0x13af   : > { %v2327_v62 = vpop.f32.mrf.mxu1 }
0x13b0   : > { %1780 = vrot.lane.b32.xlu0 %v1769_v61, %s2609_s10  ;;  %v1772_v9 = vadd.f32 %v1769_v61, %v1697_v63 }
0x13b2   : > { %v2063_v11 = vmul.f32 -1.442695, %v1772_v9 }
0x13b4   : > { %2442 = vpow2.f32 %v2063_v11 }
0x13c1   : > { %v2443_v12 = vpop.eup %2442 }
0x13c2   : > { %v1776_v13 = vadd.f32 1.0, %v2443_v12 }
0x13c4   : > { %2444 = vrcp.f32 %v1776_v13 }
0x13d1   : > { %v2445_v14 = vpop.eup %2444 }
0x13d2   : > { %v1790_v19 = vsub.f32 1.0, %v2445_v14  ;;  %v1796_v21 = vmul.f32 %v2445_v14, %v1615_v56 }
0x1422   : > { %v1781_v15 = vpop.permute.xlu0 %1780 }
0x1423   : > { %v1783_v17 = vmul.f32 %v2445_v14, %v1781_v15 }
0x1425   : > { %1785 = vrot.lane.b32.xlu1 %v1783_v17, %s2609_s10  ;;  %s1802_s10 = scalar_lea.vmem %s2933_s26, %s2060_s27 [#allocation8] }
0x1497   : > { %v1786_v10 = vpop.permute.xlu1 %1785 }
0x1498   : > { %v1788_v18 = vadd.f32 %v1786_v10, %v1697_v63 }
0x149a   : > { %2446 = vtanh.f32 %v1788_v18 }
0x14a7   : > { %v2447_v16 = vpop.eup %2446 }
0x14a8   : > { %1792 = vrot.lane.b32.xlu0 %v2447_v16, %s2610_s6 }
0x151a   : > { %v1793_v20 = vpop.permute.xlu0 %1792 }
0x151b   : > { %v1795_v22 = vmul.f32 %v1793_v20, %v1790_v19 }
0x151d   : > { %v1797_v23 = vadd.f32 %v1796_v21, %v1795_v22 }
0x151f   : > { %1799 = vrot.lane.b32.xlu1 %v1797_v23, %s2610_s6  ;;  %s2534_s6 = sshll.u32 %s2611_s16, 4  ;;  %s2535_s6 = int_to_ptr.vmem [resolvable:$false] %s2534_s6 }
0x1520   : > { %s2536_s24 = scalar_lea.vmem %s2535_s6, 512  ;;  %p2537_p11 = scmp.lt.s32.totalorder %s3169_s15, %s2535_s6 }
0x1521   : > { %p2538_p12 = scmp.lt.s32.totalorder %s2536_s24, %s2530_s17 }
0x1523   : > { %p2539_p2 = por %p2538_p12, %p2537_p11 }
0x1525   : > { %p2540_p7 = pnand %p2539_p2, %p2533_p5 }
0x1591   : > { %v1800_v24 = vpop.permute.xlu1 %1799 }
0x1592   : > { %1803 = vst.msk [vmem:[%s1802_s10] sm:$0x3] %vm527_vm2, %v1800_v24 }
0x1593   : > { %2543 = shalt.err (!%p2540_p7)
}
0x1594   : > { %s2544_s26 = scalar_lea.hbm %s3177_s14, 256  ;;  %s2548_s8 = scalar_lea.hbm %s3226_s5, 512 }
0x1595   : > { %p2545_p0 = scmp.ne.s32.totalorder %s3177_s14, %s2544_s26  ;;  %p2549_p13 = scmp.lt.s32.totalorder %s3177_s14, %s3226_s5 }
0x1596   : > { %p2550_p8 = scmp.lt.s32.totalorder %s2548_s8, %s2544_s26 }
0x1597   : > { %p2546_p3 = pnand %p2545_p0, %p3242_p4 }
0x1598   : > { %p2551_p9 = por %p2550_p8, %p2549_p13 }
0x1599   : > { %p2547_p6 = pneg %p2546_p3 }
0x159b   : > { %p2552_p10 = pnand %p2551_p9, %p2547_p6 }
0x159d   : > { %2555 = shalt.err (!%p2552_p10)
}
0x159e   : > { %s2612_s10 = smov 32   ;;  %s2613_s9 = smov 2  }
0x159f   : > { %2336 = dma.vmem_to_hbm [thread:$0]  (%p3242_p4), %s3169_s15, 256, %s3177_s14, %s1805_s11, %s2612_s10, %s2612_s10, %s2613_s9  }
0x15a0 PF: > { %s1833_s12 = sand.u32 1, %s2586_s18   ;;  %p3243_p1 = scmp.ne.s32.totalorder %s3234_s29, 0 }
0x15a1   : > { %p3244_p5 = scmp.ge.s32.totalorder %s2598_s21, 2  ;;  %s1834_s17 = scalar_lea.sflag [#allocation4], %s1833_s12 }
0x15a3   : > { %p2350_p11 = pnand %p3244_p5, %p3243_p1 }
0x15a5   : > { %p2351_p12 = pneg %p2350_p11 }
0x15a7   : > { %2581 = dma.done.wait (%p2351_p12), %s1834_s17, 256  }
0x15a8   : > { %2583 = vsyncadd (%p2351_p12), %s1834_s17, 4294967040  ;;  %p19_p2 = scmp.ge.s32.totalorder %s2665_s22, 4   ;;  %s3245_s18 = smov %s2590_s19 }
0x15a9   : > { %s3246_s19 = smov %s2594_s20  ;;  %s3247_s20 = smov %s2676_s25 }
0x15aa   : > { %s3248_s21 = smov %s2665_s22  ;;  %21 = sbr.rel (!%p19_p2) target bundleno = 6 (0x6), region = 123 }
0x15af   :  { %1839 = vsyncpa [#allocation3], 1 }
0x15b0   :  { %1841 = vsyncpa [#allocation3 + $0x1], 1 }
0x15b1   :  { %1842 = vsyncpa [#allocation6], 1 }
0x15b2   :  { %1844 = vsyncpa [#allocation6 + $0x1], 1 }
0x15b3   :  { %1845 = vsyncpa [#allocation4], 1 }
0x15b4   :  { %1847 = vsyncpa [#allocation4 + $0x1], 1 }

</bundles_post_ra>
